<compile_context>
chip_gen: v6e
topology: v6e:2x2x1
jax: 0.10.0
libtpu: 0.0.40
codegen_flags: <defaults>
</compile_context>

<pallas_src>
import functools

import numpy as np
import jax
import jax.numpy as jnp
from jax.experimental import pallas as pl
from jax.experimental.pallas import tpu as pltpu

# ---------------- configuration (small shapes consistent with the module) ----
B = 2                  # batch_size
D = 4                  # max_doc_len (utterances per document)
H = 32                 # stand-in for bert hidden_size (768 in the original)
N_EMOTION = 7
N_CAUSE = 2
N_EXPERT = 2
EXPERT_HIDDEN = 256
GUIDING_LAMBDA = 0.0   # module default

CONCAT = H + N_EMOTION + 1           # 40  (repr + emotion + speaker)
N_PAIRS = D * (D + 1) // 2           # 10 lower-triangular utterance pairs
ROWS_X = B * D                       # 8  utterance rows (already 8-aligned)
ROWS_P = B * N_PAIRS                 # 20 pair rows
ROWS_P_PAD = 24                      # pad pair rows to a multiple of 8 sublanes
LANE = 128                           # lane-dense padded feature width
EMO_COL = H                          # emotion logits live at cols [32, 39)
SPK_COL = H + N_EMOTION              # speaker id lives at col 39
WIDE_HID = N_EXPERT * EXPERT_HIDDEN  # 512


# ------------------------------ Pallas kernel ---------------------------------
def _argmax_lane(v):
    """First-max argmax along the lane axis (matches torch/np argmax ties)."""
    mx = jnp.max(v, axis=-1, keepdims=True)
    idx = jax.lax.broadcasted_iota(jnp.int32, v.shape, 1)
    return jnp.min(jnp.where(v >= mx, idx, v.shape[-1]), axis=-1, keepdims=True)


def _fused_forward_kernel(x_ref, spk_ref, a_ref, brow_ref, sf_ref, ss_ref,
                          wga_ref, wgb_ref, bgate_ref,
                          w1a_ref, w1b_ref, b1_ref, w2_ref, b2m_ref,
                          concat_ref, cause_ref):
    f32 = jnp.float32

    # (1) lane-padded concat embedding: cols [0:H)=repr, [H:H+7)=emotion logits,
    #     col 39 = speaker, cols 40..127 = 0.  One K=H matmul + speaker insert.
    ce = jnp.dot(x_ref[...], a_ref[...], preferred_element_type=f32) + brow_ref[...]
    col = jax.lax.broadcasted_iota(jnp.int32, ce.shape, 1)
    ce = ce + jnp.where(col == SPK_COL, spk_ref[...], 0.0)
    concat_ref[...] = ce                                   # lane-dense (8, 128) store

    # (2) static pair gather as 0/1 selection matmuls (no XLA gather / concat).
    first = jnp.dot(sf_ref[...], ce, preferred_element_type=f32)    # (24, 128)
    second = jnp.dot(ss_ref[...], ce, preferred_element_type=f32)   # (24, 128)

    # (3) gating logits: split-weight form of concat(pair_first, pair_second) @ w_gate.
    gate_logit = (jnp.dot(first, wga_ref[...], preferred_element_type=f32)
                  + jnp.dot(second, wgb_ref[...], preferred_element_type=f32)
                  + bgate_ref[...])                                  # (24, 2)

    # (4) rule-based guided label (first N_EXPERT columns of the 4-wide one-hot).
    spk_eq = first[:, SPK_COL:SPK_COL + 1] == second[:, SPK_COL:SPK_COL + 1]
    emo_eq = (_argmax_lane(first[:, EMO_COL:EMO_COL + N_EMOTION])
              == _argmax_lane(second[:, EMO_COL:EMO_COL + N_EMOTION]))
    l0 = jnp.where(jnp.logical_and(spk_eq, emo_eq), 1.0, 0.0)
    l1 = jnp.where(jnp.logical_and(spk_eq, jnp.logical_not(emo_eq)), 1.0, 0.0)
    col2 = jax.lax.broadcasted_iota(jnp.int32, gate_logit.shape, 1)
    label2 = jnp.where(col2 == 0, l0, l1)          # TODO(synk): N_EXPERT==2 assumed
    gate_logit = GUIDING_LAMBDA * label2 + (1.0 - GUIDING_LAMBDA) * gate_logit

    # (5) softmax over experts (exp on EUP; approx reciprocal is EUP-slot free).
    m = jnp.max(gate_logit, axis=-1, keepdims=True)
    ex = jnp.exp(gate_logit - m)
    gate_prob = ex * pl.reciprocal(jnp.sum(ex, axis=-1, keepdims=True), approx=True)

    # (6) experts collapsed into wide matmuls: hidden is (24, 512) holding both
    #     experts side by side; gate weighting folded in as a lane mask; single
    #     K=512 output matmul against the vertically stacked (padded) w2.
    hidden = (jnp.dot(first, w1a_ref[...], preferred_element_type=f32)
              + jnp.dot(second, w1b_ref[...], preferred_element_type=f32)
              + b1_ref[...])                                         # (24, 512)
    hcol = jax.lax.broadcasted_iota(jnp.int32, hidden.shape, 1)
    gate_expand = jnp.where(hcol < EXPERT_HIDDEN,
                            gate_prob[:, 0:1], gate_prob[:, 1:2])    # (24, 512)
    cause = jnp.dot(hidden * gate_expand, w2_ref[...],
                    preferred_element_type=f32)                      # (24, 128)
    cause = (cause
             + gate_prob[:, 0:1] * b2m_ref[0:1, :]
             + gate_prob[:, 1:2] * b2m_ref[1:2, :])
    cause_ref[...] = cause                                 # lane-dense (24, 128) store


def fused_forward_pallas(fp, x, spk):
    """One fused pallas_call for the whole forward. x:(8,32), spk:(8,1)."""
    inputs = (x, spk, fp["a"], fp["brow"], fp["sfirst"], fp["ssecond"],
              fp["wga"], fp["wgb"], fp["bgate"],
              fp["w1a"], fp["w1b"], fp["b1"], fp["w2"], fp["b2m"])
    full = lambda shape: pl.BlockSpec(shape, lambda i: (0, 0))
    return pl.pallas_call(
        _fused_forward_kernel,
        out_shape=(jax.ShapeDtypeStruct((ROWS_X, LANE), jnp.float32),
                   jax.ShapeDtypeStruct((ROWS_P_PAD, LANE), jnp.float32)),
        grid=(1,),
        in_specs=[full(t.shape) for t in inputs],
        out_specs=(full((ROWS_X, LANE)), full((ROWS_P_PAD, LANE))),
        compiler_params=pltpu.CompilerParams(dimension_semantics=("arbitrary",)),
    )(*inputs)


# ------------------------------- param / constant prep ------------------------
def _pair_indices(doc_len):
    t_list, e_list = [], []
    for end_t in range(doc_len):
        for t in range(end_t + 1):
            t_list.append(t)
            e_list.append(end_t)
    return t_list, e_list


def _selection_matrices():
    """0/1 matrices selecting the first / second utterance of each pair row."""
    t_idx, e_idx = _pair_indices(D)
    sf = np.zeros((ROWS_P_PAD, ROWS_X), np.float32)
    ss = np.zeros((ROWS_P_PAD, ROWS_X), np.float32)
    for b in range(B):
        for p, (t, e) in enumerate(zip(t_idx, e_idx)):
            r = b * N_PAIRS + p
            sf[r, b * D + t] = 1.0
            ss[r, b * D + e] = 1.0
    return jnp.asarray(sf), jnp.asarray(ss)    # padded rows 20..23 stay all-zero


def init_params(key):
    """Deterministic PyTorch-Linear-style init. Weights stored as (in, out)."""
    def linear_init(k, in_dim, out_dim):
        k1, k2 = jax.random.split(k)
        bound = 1.0 / (in_dim ** 0.5)
        w = jax.random.uniform(k1, (in_dim, out_dim), jnp.float32, -bound, bound)
        b = jax.random.uniform(k2, (1, out_dim), jnp.float32, -bound, bound)
        return w, b

    keys = jax.random.split(key, 2 + 2 * N_EXPERT)
    w_emo, b_emo = linear_init(keys[0], H, N_EMOTION)
    w_gate, b_gate = linear_init(keys[1], 2 * CONCAT, N_EXPERT)
    w1s, b1s, w2s, b2s = [], [], [], []
    for e in range(N_EXPERT):
        w1, b1 = linear_init(keys[2 + 2 * e], 2 * CONCAT, EXPERT_HIDDEN)
        w2, b2 = linear_init(keys[3 + 2 * e], EXPERT_HIDDEN, N_CAUSE)
        w1s.append(w1); b1s.append(b1[0]); w2s.append(w2); b2s.append(b2[0])
    return dict(w_emo=w_emo, b_emo=b_emo, w_gate=w_gate, b_gate=b_gate,
                w1=jnp.stack(w1s), b1=jnp.stack(b1s),
                w2=jnp.stack(w2s), b2=jnp.stack(b2s))


def prepare_fused_params(params):
    """One-time (outside the jitted forward) padding / fusion of weights."""
    f32 = jnp.float32
    # A: (H, 128) — identity copy of x into cols [0:H) + emotion_linear into [H:H+7).
    a = jnp.zeros((H, LANE), f32)
    a = a.at[:, :H].set(jnp.eye(H, dtype=f32))
    a = a.at[:, EMO_COL:EMO_COL + N_EMOTION].set(params["w_emo"])
    brow = jnp.zeros((1, LANE), f32).at[:, EMO_COL:EMO_COL + N_EMOTION].set(params["b_emo"])

    # gating weights split into first/second halves, zero-padded to 128 rows.
    wga = jnp.zeros((LANE, N_EXPERT), f32).at[:CONCAT, :].set(params["w_gate"][:CONCAT])
    wgb = jnp.zeros((LANE, N_EXPERT), f32).at[:CONCAT, :].set(params["w_gate"][CONCAT:])

    # expert layer-1 weights stacked along the output (wide K=512 hidden);
    # expert layer-2 weights stacked along the input, output padded to 128 lanes.
    w1a = jnp.zeros((LANE, WIDE_HID), f32)
    w1b = jnp.zeros((LANE, WIDE_HID), f32)
    w2s = jnp.zeros((WIDE_HID, LANE), f32)
    b2m = jnp.zeros((N_EXPERT, LANE), f32)
    for e in range(N_EXPERT):
        lo, hi = e * EXPERT_HIDDEN, (e + 1) * EXPERT_HIDDEN
        w1a = w1a.at[:CONCAT, lo:hi].set(params["w1"][e, :CONCAT])
        w1b = w1b.at[:CONCAT, lo:hi].set(params["w1"][e, CONCAT:])
        w2s = w2s.at[lo:hi, :N_CAUSE].set(params["w2"][e])
        b2m = b2m.at[e, :N_CAUSE].set(params["b2"][e])
    b1row = params["b1"].reshape(1, WIDE_HID)

    sfirst, ssecond = _selection_matrices()
    return dict(a=a, brow=brow, wga=wga, wgb=wgb, bgate=params["b_gate"],
                w1a=w1a, w1b=w1b, b1=b1row, w2=w2s, b2m=b2m,
                sfirst=sfirst, ssecond=ssecond)


# ------------------------------- forward --------------------------------------
@functools.partial(jax.jit, static_argnames=())
def guided_moe_forward(fused_params, utterance_repr, speaker_ids):
    """utterance_repr: (B, D, H); speaker_ids: (B, D) ints.

    Returns (emotion_pred (B*D, N_EMOTION), cause_pred (B*N_PAIRS, N_CAUSE)).
    """
    b, d, h = utterance_repr.shape
    x = utterance_repr.reshape(b * d, h)                    # dropout = identity (eval)
    spk = speaker_ids.reshape(b * d, 1).astype(jnp.float32)
    concat_pad, cause_pad = fused_forward_pallas(fused_params, x, spk)
    emotion_pred = concat_pad[:, EMO_COL:EMO_COL + N_EMOTION]
    cause_pred = cause_pad[:ROWS_P, :N_CAUSE]
    return emotion_pred, cause_pred


# ----------------------- float64 numpy reference (for checking) ---------------
def reference_forward_np(params, utterance_repr, speaker_ids):
    x = np.asarray(utterance_repr, np.float64).reshape(ROWS_X, H)
    spk = np.asarray(speaker_ids, np.float64).reshape(-1, 1)
    emo = x @ np.asarray(params["w_emo"], np.float64) + np.asarray(params["b_emo"], np.float64)
    concat = np.concatenate([x, emo, spk], axis=1).reshape(B, D, CONCAT)
    t_idx, e_idx = _pair_indices(D)
    pair = np.stack([np.concatenate([concat[b, t], concat[b, e]])
                     for b in range(B) for t, e in zip(t_idx, e_idx)])   # (20, 80)

    gating = pair @ np.asarray(params["w_gate"], np.float64) + np.asarray(params["b_gate"], np.float64)
    emo_arg = emo.reshape(B, D, N_EMOTION).argmax(-1)
    spk_b = np.asarray(speaker_ids).reshape(B, D)
    lab = np.zeros((ROWS_P, N_EXPERT))
    r = 0
    for b in range(B):
        for t, e in zip(t_idx, e_idx):
            sc = spk_b[b, t] == spk_b[b, e]
            ec = emo_arg[b, t] == emo_arg[b, e]
            if sc and ec:
                lab[r, 0] = 1.0
            elif sc:
                lab[r, 1] = 1.0
            r += 1
    gating = GUIDING_LAMBDA * lab + (1.0 - GUIDING_LAMBDA) * gating
    gp = np.exp(gating - gating.max(-1, keepdims=True))
    gp = gp / gp.sum(-1, keepdims=True)

    cause = np.zeros((ROWS_P, N_CAUSE))
    for e in range(N_EXPERT):
        hid = pair @ np.asarray(params["w1"][e], np.float64) + np.asarray(params["b1"][e], np.float64)
        lg = hid @ np.asarray(params["w2"][e], np.float64) + np.asarray(params["b2"][e], np.float64)
        cause += gp[:, e:e + 1] * lg
    return emo, cause


# --------------------------------- main ----------------------------------------
if __name__ == "__main__":
    key = jax.random.PRNGKey(0)
    k_p, k_x, k_s = jax.random.split(key, 3)

    params = init_params(k_p)
    fused_params = prepare_fused_params(params)
    utterance_repr = jax.random.normal(k_x, (B, D, H), jnp.float32)
    speaker_ids = jax.random.randint(k_s, (B, D), 0, 2).astype(jnp.int32)

    emotion_pred, cause_pred = guided_moe_forward(fused_params, utterance_repr, speaker_ids)
    jax.block_until_ready((emotion_pred, cause_pred))

    assert emotion_pred.shape == (B * D, N_EMOTION)
    assert cause_pred.shape == (B * N_PAIRS, N_CAUSE)
    assert bool(jnp.all(jnp.isfinite(emotion_pred))) and bool(jnp.all(jnp.isfinite(cause_pred)))

    # structural-correctness check against a float64 numpy reference
    emo_ref, cause_ref = reference_forward_np(params, utterance_repr, speaker_ids)
    np.testing.assert_allclose(np.asarray(emotion_pred), emo_ref, rtol=2e-2, atol=5e-2)
    np.testing.assert_allclose(np.asarray(cause_pred), cause_ref, rtol=5e-2, atol=1e-1)

    print("KERNEL_OK")
</pallas_src>

<mosaic_0001>
module attributes {stable_mosaic.version = 11 : i64} {
  func.func @_fused_forward_kernel(%arg0: i32, %arg1: memref<8x32xf32, #tpu.memory_space<vmem>>, %arg2: memref<8x1xf32, #tpu.memory_space<vmem>>, %arg3: memref<32x128xf32, #tpu.memory_space<vmem>>, %arg4: memref<1x128xf32, #tpu.memory_space<vmem>>, %arg5: memref<24x8xf32, #tpu.memory_space<vmem>>, %arg6: memref<24x8xf32, #tpu.memory_space<vmem>>, %arg7: memref<128x2xf32, #tpu.memory_space<vmem>>, %arg8: memref<128x2xf32, #tpu.memory_space<vmem>>, %arg9: memref<1x2xf32, #tpu.memory_space<vmem>>, %arg10: memref<128x512xf32, #tpu.memory_space<vmem>>, %arg11: memref<128x512xf32, #tpu.memory_space<vmem>>, %arg12: memref<1x512xf32, #tpu.memory_space<vmem>>, %arg13: memref<512x128xf32, #tpu.memory_space<vmem>>, %arg14: memref<2x128xf32, #tpu.memory_space<vmem>>, %arg15: memref<8x128xf32, #tpu.memory_space<vmem>>, %arg16: memref<24x128xf32, #tpu.memory_space<vmem>>) attributes {dimension_semantics = [#tpu.dimension_semantics<arbitrary>], iteration_bounds = array<i64: 1>, scalar_prefetch = 0 : i64, scratch_operands = 0 : i64, tpu.core_type = #tpu.core_type<tc>, window_params = [{pipeline_mode = #tpu.pipeline_mode<synchronous>, transform_indices = @transform_0, window_bounds = array<i64: 8, 32>}, {pipeline_mode = #tpu.pipeline_mode<synchronous>, transform_indices = @transform_1, window_bounds = array<i64: 8, 1>}, {pipeline_mode = #tpu.pipeline_mode<synchronous>, transform_indices = @transform_2, window_bounds = array<i64: 32, 128>}, {pipeline_mode = #tpu.pipeline_mode<synchronous>, transform_indices = @transform_3, window_bounds = array<i64: 1, 128>}, {pipeline_mode = #tpu.pipeline_mode<synchronous>, transform_indices = @transform_4, window_bounds = array<i64: 24, 8>}, {pipeline_mode = #tpu.pipeline_mode<synchronous>, transform_indices = @transform_5, window_bounds = array<i64: 24, 8>}, {pipeline_mode = #tpu.pipeline_mode<synchronous>, transform_indices = @transform_6, window_bounds = array<i64: 128, 2>}, {pipeline_mode = #tpu.pipeline_mode<synchronous>, transform_indices = @transform_7, window_bounds = array<i64: 128, 2>}, {pipeline_mode = #tpu.pipeline_mode<synchronous>, transform_indices = @transform_8, window_bounds = array<i64: 1, 2>}, {pipeline_mode = #tpu.pipeline_mode<synchronous>, transform_indices = @transform_9, window_bounds = array<i64: 128, 512>}, {pipeline_mode = #tpu.pipeline_mode<synchronous>, transform_indices = @transform_10, window_bounds = array<i64: 128, 512>}, {pipeline_mode = #tpu.pipeline_mode<synchronous>, transform_indices = @transform_11, window_bounds = array<i64: 1, 512>}, {pipeline_mode = #tpu.pipeline_mode<synchronous>, transform_indices = @transform_12, window_bounds = array<i64: 512, 128>}, {pipeline_mode = #tpu.pipeline_mode<synchronous>, transform_indices = @transform_13, window_bounds = array<i64: 2, 128>}, {pipeline_mode = #tpu.pipeline_mode<synchronous>, transform_indices = @transform_14, window_bounds = array<i64: 8, 128>}, {pipeline_mode = #tpu.pipeline_mode<synchronous>, transform_indices = @transform_15, window_bounds = array<i64: 24, 128>}]} {
    %c0 = arith.constant 0 : index
    %c0_0 = arith.constant 0 : index
    %0 = vector.load %arg1[%c0, %c0_0] : memref<8x32xf32, #tpu.memory_space<vmem>>, vector<8x32xf32>
    %c0_1 = arith.constant 0 : index
    %c0_2 = arith.constant 0 : index
    %1 = vector.load %arg3[%c0_1, %c0_2] : memref<32x128xf32, #tpu.memory_space<vmem>>, vector<32x128xf32>
    %cst = arith.constant dense<0.000000e+00> : vector<8x128xf32>
    %2 = tpu.matmul %0, %1, %cst {dimension_numbers = #tpu.dot_dimension_numbers<[1], [0], [0], [1], [0, 0, 1, 1], [], []>} : vector<8x32xf32>, vector<32x128xf32>, vector<8x128xf32> -> vector<8x128xf32>
    %c0_3 = arith.constant 0 : index
    %c0_4 = arith.constant 0 : index
    %3 = vector.load %arg4[%c0_3, %c0_4] : memref<1x128xf32, #tpu.memory_space<vmem>>, vector<1x128xf32>
    %4 = vector.broadcast %3 : vector<1x128xf32> to vector<8x128xf32>
    %5 = arith.addf %2, %4 : vector<8x128xf32>
    %6 = tpu.iota {dimensions = array<i32: 1>} : vector<8x128xi32>
    %c39_i32 = arith.constant 39 : i32
    %7 = vector.broadcast %c39_i32 : i32 to vector<8x128xi32>
    %8 = arith.cmpi eq, %6, %7 : vector<8x128xi32>
    %c0_5 = arith.constant 0 : index
    %c0_6 = arith.constant 0 : index
    %9 = vector.load %arg2[%c0_5, %c0_6] : memref<8x1xf32, #tpu.memory_space<vmem>>, vector<8x1xf32>
    %cst_7 = arith.constant 0.000000e+00 : f32
    %10 = vector.shape_cast %9 : vector<8x1xf32> to vector<8x1xf32>
    %11 = vector.broadcast %10 : vector<8x1xf32> to vector<8x128xf32>
    %12 = vector.broadcast %cst_7 : f32 to vector<8x128xf32>
    %13 = arith.select %8, %11, %12 : vector<8x128xi1>, vector<8x128xf32>
    %14 = arith.addf %5, %13 : vector<8x128xf32>
    %c0_8 = arith.constant 0 : index
    %c0_9 = arith.constant 0 : index
    %15 = vector.load %arg15[%c0_8, %c0_9] : memref<8x128xf32, #tpu.memory_space<vmem>>, vector<8x128xf32>
    tpu.vector_store %arg15[%c0_8, %c0_9], %14 {strides = array<i32>} : memref<8x128xf32, #tpu.memory_space<vmem>>, vector<8x128xf32>,
    %c0_10 = arith.constant 0 : index
    %c0_11 = arith.constant 0 : index
    %16 = vector.load %arg5[%c0_10, %c0_11] : memref<24x8xf32, #tpu.memory_space<vmem>>, vector<24x8xf32>
    %cst_12 = arith.constant dense<0.000000e+00> : vector<24x128xf32>
    %17 = tpu.matmul %16, %14, %cst_12 {dimension_numbers = #tpu.dot_dimension_numbers<[1], [0], [0], [1], [0, 0, 1, 1], [], []>} : vector<24x8xf32>, vector<8x128xf32>, vector<24x128xf32> -> vector<24x128xf32>
    %c0_13 = arith.constant 0 : index
    %c0_14 = arith.constant 0 : index
    %18 = vector.load %arg6[%c0_13, %c0_14] : memref<24x8xf32, #tpu.memory_space<vmem>>, vector<24x8xf32>
    %cst_15 = arith.constant dense<0.000000e+00> : vector<24x128xf32>
    %19 = tpu.matmul %18, %14, %cst_15 {dimension_numbers = #tpu.dot_dimension_numbers<[1], [0], [0], [1], [0, 0, 1, 1], [], []>} : vector<24x8xf32>, vector<8x128xf32>, vector<24x128xf32> -> vector<24x128xf32>
    %c0_16 = arith.constant 0 : index
    %c0_17 = arith.constant 0 : index
    %20 = vector.load %arg7[%c0_16, %c0_17] : memref<128x2xf32, #tpu.memory_space<vmem>>, vector<128x2xf32>
    %cst_18 = arith.constant dense<0.000000e+00> : vector<24x2xf32>
    %21 = tpu.matmul %17, %20, %cst_18 {dimension_numbers = #tpu.dot_dimension_numbers<[1], [0], [0], [1], [0, 0, 1, 1], [], []>} : vector<24x128xf32>, vector<128x2xf32>, vector<24x2xf32> -> vector<24x2xf32>
    %c0_19 = arith.constant 0 : index
    %c0_20 = arith.constant 0 : index
    %22 = vector.load %arg8[%c0_19, %c0_20] : memref<128x2xf32, #tpu.memory_space<vmem>>, vector<128x2xf32>
    %cst_21 = arith.constant dense<0.000000e+00> : vector<24x2xf32>
    %23 = tpu.matmul %19, %22, %cst_21 {dimension_numbers = #tpu.dot_dimension_numbers<[1], [0], [0], [1], [0, 0, 1, 1], [], []>} : vector<24x128xf32>, vector<128x2xf32>, vector<24x2xf32> -> vector<24x2xf32>
    %24 = arith.addf %21, %23 : vector<24x2xf32>
    %c0_22 = arith.constant 0 : index
    %c0_23 = arith.constant 0 : index
    %25 = vector.load %arg9[%c0_22, %c0_23] : memref<1x2xf32, #tpu.memory_space<vmem>>, vector<1x2xf32>
    %26 = vector.broadcast %25 : vector<1x2xf32> to vector<24x2xf32>
    %27 = arith.addf %24, %26 : vector<24x2xf32>
    %28 = vector.extract_strided_slice %17 {offsets = [0, 39], sizes = [24, 1], strides = [1, 1]} : vector<24x128xf32> to vector<24x1xf32>
    %29 = vector.extract_strided_slice %19 {offsets = [0, 39], sizes = [24, 1], strides = [1, 1]} : vector<24x128xf32> to vector<24x1xf32>
    %30 = arith.cmpf oeq, %28, %29 : vector<24x1xf32>
    %31 = vector.extract_strided_slice %17 {offsets = [0, 32], sizes = [24, 7], strides = [1, 1]} : vector<24x128xf32> to vector<24x7xf32>
    %cst_24 = arith.constant dense<0xFF800000> : vector<24xf32>
    %32 = vector.multi_reduction <maximumf>, %31, %cst_24 [1] : vector<24x7xf32> to vector<24xf32>
    %33 = vector.shape_cast %32 : vector<24xf32> to vector<24x1xf32>
    %34 = tpu.iota {dimensions = array<i32: 1>} : vector<24x7xi32>
    %35 = vector.broadcast %33 : vector<24x1xf32> to vector<24x7xf32>
    %36 = arith.cmpf oge, %31, %35 : vector<24x7xf32>
    %c7_i32 = arith.constant 7 : i32
    %37 = vector.broadcast %c7_i32 : i32 to vector<24x7xi32>
    %38 = arith.select %36, %34, %37 : vector<24x7xi1>, vector<24x7xi32>
    %cst_25 = arith.constant dense<2147483647> : vector<24xi32>
    %39 = vector.multi_reduction <minsi>, %38, %cst_25 [1] : vector<24x7xi32> to vector<24xi32>
    %40 = vector.shape_cast %39 : vector<24xi32> to vector<24x1xi32>
    %41 = vector.extract_strided_slice %19 {offsets = [0, 32], sizes = [24, 7], strides = [1, 1]} : vector<24x128xf32> to vector<24x7xf32>
    %cst_26 = arith.constant dense<0xFF800000> : vector<24xf32>
    %42 = vector.multi_reduction <maximumf>, %41, %cst_26 [1] : vector<24x7xf32> to vector<24xf32>
    %43 = vector.shape_cast %42 : vector<24xf32> to vector<24x1xf32>
    %44 = tpu.iota {dimensions = array<i32: 1>} : vector<24x7xi32>
    %45 = vector.broadcast %43 : vector<24x1xf32> to vector<24x7xf32>
    %46 = arith.cmpf oge, %41, %45 : vector<24x7xf32>
    %c7_i32_27 = arith.constant 7 : i32
    %47 = vector.broadcast %c7_i32_27 : i32 to vector<24x7xi32>
    %48 = arith.select %46, %44, %47 : vector<24x7xi1>, vector<24x7xi32>
    %cst_28 = arith.constant dense<2147483647> : vector<24xi32>
    %49 = vector.multi_reduction <minsi>, %48, %cst_28 [1] : vector<24x7xi32> to vector<24xi32>
    %50 = vector.shape_cast %49 : vector<24xi32> to vector<24x1xi32>
    %51 = arith.cmpi eq, %40, %50 : vector<24x1xi32>
    %52 = arith.andi %30, %51 : vector<24x1xi1>
    %cst_29 = arith.constant 1.000000e+00 : f32
    %cst_30 = arith.constant 0.000000e+00 : f32
    %53 = vector.broadcast %cst_29 : f32 to vector<24x1xf32>
    %54 = vector.broadcast %cst_30 : f32 to vector<24x1xf32>
    %55 = arith.select %52, %53, %54 : vector<24x1xi1>, vector<24x1xf32>
    %cst_31 = arith.constant dense<true> : vector<24x1xi1>
    %56 = arith.xori %51, %cst_31 : vector<24x1xi1>
    %57 = arith.andi %30, %56 : vector<24x1xi1>
    %cst_32 = arith.constant 1.000000e+00 : f32
    %cst_33 = arith.constant 0.000000e+00 : f32
    %58 = vector.broadcast %cst_32 : f32 to vector<24x1xf32>
    %59 = vector.broadcast %cst_33 : f32 to vector<24x1xf32>
    %60 = arith.select %57, %58, %59 : vector<24x1xi1>, vector<24x1xf32>
    %61 = tpu.iota {dimensions = array<i32: 1>} : vector<24x2xi32>
    %c0_i32 = arith.constant 0 : i32
    %62 = vector.broadcast %c0_i32 : i32 to vector<24x2xi32>
    %63 = arith.cmpi eq, %61, %62 : vector<24x2xi32>
    %64 = vector.shape_cast %55 : vector<24x1xf32> to vector<24x1xf32>
    %65 = vector.broadcast %64 : vector<24x1xf32> to vector<24x2xf32>
    %66 = vector.shape_cast %60 : vector<24x1xf32> to vector<24x1xf32>
    %67 = vector.broadcast %66 : vector<24x1xf32> to vector<24x2xf32>
    %68 = arith.select %63, %65, %67 : vector<24x2xi1>, vector<24x2xf32>
    %cst_34 = arith.constant 0.000000e+00 : f32
    %69 = vector.broadcast %cst_34 : f32 to vector<24x2xf32>
    %70 = arith.mulf %69, %68 : vector<24x2xf32>
    %cst_35 = arith.constant 1.000000e+00 : f32
    %71 = vector.broadcast %cst_35 : f32 to vector<24x2xf32>
    %72 = arith.mulf %71, %27 : vector<24x2xf32>
    %73 = arith.addf %70, %72 : vector<24x2xf32>
    %cst_36 = arith.constant dense<0xFF800000> : vector<24xf32>
    %74 = vector.multi_reduction <maximumf>, %73, %cst_36 [1] : vector<24x2xf32> to vector<24xf32>
    %75 = vector.shape_cast %74 : vector<24xf32> to vector<24x1xf32>
    %76 = vector.broadcast %75 : vector<24x1xf32> to vector<24x2xf32>
    %77 = arith.subf %73, %76 : vector<24x2xf32>
    %78 = math.exp %77 : vector<24x2xf32>
    %cst_37 = arith.constant dense<0.000000e+00> : vector<24xf32>
    %79 = vector.multi_reduction <add>, %78, %cst_37 [1] : vector<24x2xf32> to vector<24xf32>
    %80 = vector.shape_cast %79 : vector<24xf32> to vector<24x1xf32>
    %81 = tpu.reciprocal %80 {approx = true} : vector<24x1xf32> -> vector<24x1xf32>
    %82 = vector.broadcast %81 : vector<24x1xf32> to vector<24x2xf32>
    %83 = arith.mulf %78, %82 : vector<24x2xf32>
    %c0_38 = arith.constant 0 : index
    %c0_39 = arith.constant 0 : index
    %84 = vector.load %arg10[%c0_38, %c0_39] : memref<128x512xf32, #tpu.memory_space<vmem>>, vector<128x512xf32>
    %cst_40 = arith.constant dense<0.000000e+00> : vector<24x512xf32>
    %85 = tpu.matmul %17, %84, %cst_40 {dimension_numbers = #tpu.dot_dimension_numbers<[1], [0], [0], [1], [0, 0, 1, 1], [], []>} : vector<24x128xf32>, vector<128x512xf32>, vector<24x512xf32> -> vector<24x512xf32>
    %c0_41 = arith.constant 0 : index
    %c0_42 = arith.constant 0 : index
    %86 = vector.load %arg11[%c0_41, %c0_42] : memref<128x512xf32, #tpu.memory_space<vmem>>, vector<128x512xf32>
    %cst_43 = arith.constant dense<0.000000e+00> : vector<24x512xf32>
    %87 = tpu.matmul %19, %86, %cst_43 {dimension_numbers = #tpu.dot_dimension_numbers<[1], [0], [0], [1], [0, 0, 1, 1], [], []>} : vector<24x128xf32>, vector<128x512xf32>, vector<24x512xf32> -> vector<24x512xf32>
    %88 = arith.addf %85, %87 : vector<24x512xf32>
    %c0_44 = arith.constant 0 : index
    %c0_45 = arith.constant 0 : index
    %89 = vector.load %arg12[%c0_44, %c0_45] : memref<1x512xf32, #tpu.memory_space<vmem>>, vector<1x512xf32>
    %90 = vector.broadcast %89 : vector<1x512xf32> to vector<24x512xf32>
    %91 = arith.addf %88, %90 : vector<24x512xf32>
    %92 = tpu.iota {dimensions = array<i32: 1>} : vector<24x512xi32>
    %c256_i32 = arith.constant 256 : i32
    %93 = vector.broadcast %c256_i32 : i32 to vector<24x512xi32>
    %94 = arith.cmpi slt, %92, %93 : vector<24x512xi32>
    %95 = vector.extract_strided_slice %83 {offsets = [0, 0], sizes = [24, 1], strides = [1, 1]} : vector<24x2xf32> to vector<24x1xf32>
    %96 = vector.extract_strided_slice %83 {offsets = [0, 1], sizes = [24, 1], strides = [1, 1]} : vector<24x2xf32> to vector<24x1xf32>
    %97 = vector.shape_cast %95 : vector<24x1xf32> to vector<24x1xf32>
    %98 = vector.broadcast %97 : vector<24x1xf32> to vector<24x512xf32>
    %99 = vector.shape_cast %96 : vector<24x1xf32> to vector<24x1xf32>
    %100 = vector.broadcast %99 : vector<24x1xf32> to vector<24x512xf32>
    %101 = arith.select %94, %98, %100 : vector<24x512xi1>, vector<24x512xf32>
    %102 = arith.mulf %91, %101 : vector<24x512xf32>
    %c0_46 = arith.constant 0 : index
    %c0_47 = arith.constant 0 : index
    %103 = vector.load %arg13[%c0_46, %c0_47] : memref<512x128xf32, #tpu.memory_space<vmem>>, vector<512x128xf32>
    %cst_48 = arith.constant dense<0.000000e+00> : vector<24x128xf32>
    %104 = tpu.matmul %102, %103, %cst_48 {dimension_numbers = #tpu.dot_dimension_numbers<[1], [0], [0], [1], [0, 0, 1, 1], [], []>} : vector<24x512xf32>, vector<512x128xf32>, vector<24x128xf32> -> vector<24x128xf32>
    %105 = vector.extract_strided_slice %83 {offsets = [0, 0], sizes = [24, 1], strides = [1, 1]} : vector<24x2xf32> to vector<24x1xf32>
    %c0_49 = arith.constant 0 : index
    %c0_50 = arith.constant 0 : index
    %106 = vector.load %arg14[%c0_49, %c0_50] : memref<2x128xf32, #tpu.memory_space<vmem>>, vector<1x128xf32>
    %107 = vector.broadcast %105 : vector<24x1xf32> to vector<24x128xf32>
    %108 = vector.broadcast %106 : vector<1x128xf32> to vector<24x128xf32>
    %109 = arith.mulf %107, %108 : vector<24x128xf32>
    %110 = arith.addf %104, %109 : vector<24x128xf32>
    %111 = vector.extract_strided_slice %83 {offsets = [0, 1], sizes = [24, 1], strides = [1, 1]} : vector<24x2xf32> to vector<24x1xf32>
    %c1 = arith.constant 1 : index
    %c0_51 = arith.constant 0 : index
    %112 = vector.load %arg14[%c1, %c0_51] : memref<2x128xf32, #tpu.memory_space<vmem>>, vector<1x128xf32>
    %113 = vector.broadcast %111 : vector<24x1xf32> to vector<24x128xf32>
    %114 = vector.broadcast %112 : vector<1x128xf32> to vector<24x128xf32>
    %115 = arith.mulf %113, %114 : vector<24x128xf32>
    %116 = arith.addf %110, %115 : vector<24x128xf32>
    %c0_52 = arith.constant 0 : index
    %c0_53 = arith.constant 0 : index
    %117 = vector.load %arg16[%c0_52, %c0_53] : memref<24x128xf32, #tpu.memory_space<vmem>>, vector<24x128xf32>
    tpu.vector_store %arg16[%c0_52, %c0_53], %116 {strides = array<i32>} : memref<24x128xf32, #tpu.memory_space<vmem>>, vector<24x128xf32>,
    return
  }
  func.func @transform_0(%arg0: i32) -> (i32, i32) {
    %c0_i32 = arith.constant 0 : i32
    %c0_i32_0 = arith.constant 0 : i32
    %c0_i32_1 = arith.constant 0 : i32
    return %c0_i32, %c0_i32_0 : i32, i32
  }
  func.func @transform_1(%arg0: i32) -> (i32, i32) {
    %c0_i32 = arith.constant 0 : i32
    %c0_i32_0 = arith.constant 0 : i32
    %c0_i32_1 = arith.constant 0 : i32
    return %c0_i32, %c0_i32_0 : i32, i32
  }
  func.func @transform_2(%arg0: i32) -> (i32, i32) {
    %c0_i32 = arith.constant 0 : i32
    %c0_i32_0 = arith.constant 0 : i32
    %c0_i32_1 = arith.constant 0 : i32
    return %c0_i32, %c0_i32_0 : i32, i32
  }
  func.func @transform_3(%arg0: i32) -> (i32, i32) {
    %c0_i32 = arith.constant 0 : i32
    %c0_i32_0 = arith.constant 0 : i32
    %c0_i32_1 = arith.constant 0 : i32
    return %c0_i32, %c0_i32_0 : i32, i32
  }
  func.func @transform_4(%arg0: i32) -> (i32, i32) {
    %c0_i32 = arith.constant 0 : i32
    %c0_i32_0 = arith.constant 0 : i32
    %c0_i32_1 = arith.constant 0 : i32
    return %c0_i32, %c0_i32_0 : i32, i32
  }
  func.func @transform_5(%arg0: i32) -> (i32, i32) {
    %c0_i32 = arith.constant 0 : i32
    %c0_i32_0 = arith.constant 0 : i32
    %c0_i32_1 = arith.constant 0 : i32
    return %c0_i32, %c0_i32_0 : i32, i32
  }
  func.func @transform_6(%arg0: i32) -> (i32, i32) {
    %c0_i32 = arith.constant 0 : i32
    %c0_i32_0 = arith.constant 0 : i32
    %c0_i32_1 = arith.constant 0 : i32
    return %c0_i32, %c0_i32_0 : i32, i32
  }
  func.func @transform_7(%arg0: i32) -> (i32, i32) {
    %c0_i32 = arith.constant 0 : i32
    %c0_i32_0 = arith.constant 0 : i32
    %c0_i32_1 = arith.constant 0 : i32
    return %c0_i32, %c0_i32_0 : i32, i32
  }
  func.func @transform_8(%arg0: i32) -> (i32, i32) {
    %c0_i32 = arith.constant 0 : i32
    %c0_i32_0 = arith.constant 0 : i32
    %c0_i32_1 = arith.constant 0 : i32
    return %c0_i32, %c0_i32_0 : i32, i32
  }
  func.func @transform_9(%arg0: i32) -> (i32, i32) {
    %c0_i32 = arith.constant 0 : i32
    %c0_i32_0 = arith.constant 0 : i32
    %c0_i32_1 = arith.constant 0 : i32
    return %c0_i32, %c0_i32_0 : i32, i32
  }
  func.func @transform_10(%arg0: i32) -> (i32, i32) {
    %c0_i32 = arith.constant 0 : i32
    %c0_i32_0 = arith.constant 0 : i32
    %c0_i32_1 = arith.constant 0 : i32
    return %c0_i32, %c0_i32_0 : i32, i32
  }
  func.func @transform_11(%arg0: i32) -> (i32, i32) {
    %c0_i32 = arith.constant 0 : i32
    %c0_i32_0 = arith.constant 0 : i32
    %c0_i32_1 = arith.constant 0 : i32
    return %c0_i32, %c0_i32_0 : i32, i32
  }
  func.func @transform_12(%arg0: i32) -> (i32, i32) {
    %c0_i32 = arith.constant 0 : i32
    %c0_i32_0 = arith.constant 0 : i32
    %c0_i32_1 = arith.constant 0 : i32
    return %c0_i32, %c0_i32_0 : i32, i32
  }
  func.func @transform_13(%arg0: i32) -> (i32, i32) {
    %c0_i32 = arith.constant 0 : i32
    %c0_i32_0 = arith.constant 0 : i32
    %c0_i32_1 = arith.constant 0 : i32
    return %c0_i32, %c0_i32_0 : i32, i32
  }
  func.func @transform_14(%arg0: i32) -> (i32, i32) {
    %c0_i32 = arith.constant 0 : i32
    %c0_i32_0 = arith.constant 0 : i32
    %c0_i32_1 = arith.constant 0 : i32
    return %c0_i32, %c0_i32_0 : i32, i32
  }
  func.func @transform_15(%arg0: i32) -> (i32, i32) {
    %c0_i32 = arith.constant 0 : i32
    %c0_i32_0 = arith.constant 0 : i32
    %c0_i32_1 = arith.constant 0 : i32
    return %c0_i32, %c0_i32_0 : i32, i32
  }
}

</mosaic_0001>

<bundles_post_ra>
// kernel: guided_moe_forward.1
= control target key start
LH: loop header
LB: loop body
LE: loop exit
PB: predicated region body
PF: predicated region fallthrough
CT: control target
= control target key end

     0   :  { %21 = vsyncpa [#allocation3], 0  ;;  %s2443_s0 = inlined_call_operand.vmem [shape: f32[8,32], index: 0, kind: input, shape index: {}]   ;;  %s2444_s1 = inlined_call_operand.vmem [shape: f32[8,1], index: 1, kind: input, shape index: {}]   ;;  %s2445_s2 = inlined_call_operand.vmem [shape: f32[32,128], index: 2, kind: input, shape index: {}]   ;;  %s2446_s3 = inlined_call_operand.vmem [shape: f32[1,128], index: 3, kind: input, shape index: {}]   ;;  %s2447_s4 = inlined_call_operand.vmem [shape: f32[24,8], index: 4, kind: input, shape index: {}]   ;;  %s2448_s5 = inlined_call_operand.vmem [shape: f32[24,8], index: 5, kind: input, shape index: {}]   ;;  %s2449_s6 = inlined_call_operand.vmem [shape: f32[128,2], index: 6, kind: input, shape index: {}]   ;;  %s2450_s7 = inlined_call_operand.vmem [shape: f32[128,2], index: 7, kind: input, shape index: {}]   ;;  %s2451_s8 = inlined_call_operand.vmem [shape: f32[1,2], index: 8, kind: input, shape index: {}]   ;;  %s2452_s9 = inlined_call_operand.hbm [shape: f32[128,512], index: 9, kind: input, shape index: {}]   ;;  %s2453_s10 = inlined_call_operand.hbm [shape: f32[128,512], index: 10, kind: input, shape index: {}]   ;;  %s2454_s11 = inlined_call_operand.vmem [shape: f32[1,512], index: 11, kind: input, shape index: {}]   ;;  %s2455_s12 = inlined_call_operand.hbm [shape: f32[512,128], index: 12, kind: input, shape index: {}]   ;;  %s2456_s13 = inlined_call_operand.vmem [shape: f32[2,128], index: 13, kind: input, shape index: {}]   ;;  %s2457_s14 = inlined_call_operand.vmem [shape: f32[8,128], index: 14, kind: output, shape index: {0}]   ;;  %s2458_s15 = inlined_call_operand.vmem [shape: f32[24,128], index: 15, kind: output, shape index: {1}]  }
   0x1   :  { %22 = vsyncpa [#allocation5], 0  ;;  %s1974_s18 = smov [#allocation4]   ;;  %s1975_s20 = smov [#allocation2]  }
   0x2   :  { %s58_s19 = sshll.u32 %s1974_s18, 4  ;;  %s46_s21 = sshll.u32 %s1975_s20, 4  ;;  %s59_s19 = int_to_ptr.vmem [resolvable:$true] %s58_s19  ;;  %s47_s21 = int_to_ptr.vmem [resolvable:$true] %s46_s21 }
   0x3   :  { %s1918_s22 = scalar_lea.vmem %s59_s19, 8192  ;;  %p1923_p1 = scmp.lt.s32.totalorder %s59_s19, %s59_s19 }
   0x4   :  { %p1919_p0 = scmp.ne.s32.totalorder %s59_s19, %s1918_s22  ;;  %p1924_p2 = scmp.lt.s32.totalorder %s1918_s22, %s1918_s22 }
   0x6   :  { %p1925_p3 = por %p1924_p2, %p1923_p1 }
   0x8   :  { %p1926_p4 = pnand %p1925_p3, %p1919_p0 }
   0xa   :  { %1929 = shalt.err (!%p1926_p4)
}
   0xb   :  { %s1976_s23 = smov 512   ;;  %s1977_s24 = smov 32  }
   0xc   :  { %64 = dma.hbm_to_vmem [thread:$0]  %s2453_s10, 8192, %s59_s19, [#allocation5], %s1976_s23, %s1976_s23, %s1977_s24  }
   0xd   :  { %s1938_s27 = scalar_lea.vmem %s47_s21, 8192  ;;  %p1943_p6 = scmp.lt.s32.totalorder %s47_s21, %s47_s21 }
   0xe   :  { %p1939_p5 = scmp.ne.s32.totalorder %s47_s21, %s1938_s27  ;;  %p1944_p7 = scmp.lt.s32.totalorder %s1938_s27, %s1938_s27 }
  0x10   :  { %p1945_p8 = por %p1944_p7, %p1943_p6 }
  0x12   :  { %p1946_p9 = pnand %p1945_p8, %p1939_p5 }
  0x14   :  { %1949 = shalt.err (!%p1946_p9)
}
  0x15   :  { %52 = dma.hbm_to_vmem [thread:$0]  %s2452_s9, 8192, %s47_s21, [#allocation3], %s1976_s23, %s1976_s23, %s1977_s24  }
  0x16   :  { %s1978_s30 = smov [#allocation6]  }
  0x17   :  { %s72_s16 = sshll.u32 %s1978_s30, 4  ;;  %s73_s16 = int_to_ptr.vmem [resolvable:$true] %s72_s16 }
  0x18   :  { %s1958_s17 = scalar_lea.vmem %s73_s16, 8192  ;;  %p1963_p11 = scmp.lt.s32.totalorder %s73_s16, %s73_s16 }
  0x19   :  { %p1959_p10 = scmp.ne.s32.totalorder %s73_s16, %s1958_s17  ;;  %p1964_p12 = scmp.lt.s32.totalorder %s1958_s17, %s1958_s17 }
  0x1b   :  { %p1965_p13 = por %p1964_p12, %p1963_p11 }
  0x1d   :  { %p1966_p0 = pnand %p1965_p13, %p1959_p10 }
  0x1f   :  { %1969 = shalt.err (!%p1966_p0)
}
  0x20   :  { %s1979_s10 = smov 128   ;;  %s1980_s18 = smov 8  }
  0x21   :  { %78 = dma.hbm_to_vmem [thread:$0]  %s2455_s12, 8192, %s73_s16, [#allocation5], %s1979_s10, %s1979_s10, %s1980_s18  }
  0x22   :  { %1970 = dma.done.wait [#allocation3], 8192  }
  0x23   :  { %1971 = vsyncadd [#allocation3], 4294959104 }
  0x24   :  { %1972 = dma.done.wait [#allocation5], 16384  }
  0x25   :  { %1973 = vsyncadd [#allocation5], 4294950912  ;;  %v1981_v0 = vmov 0.0   ;;  %vm1982_vm0 = vmmov 0   ;;  %v1983_v1 = vmov 0   ;;  %v94_v2 = vld [vmem:[%s2445_s2 + $0x18] sm:$0xff]  ;;  %v176_v8 = vlaneseq }
  0x26   :  { %1745 = vmatprep.subr.mxu0 %v1981_v0  ;;  %1753 = vmatprep.mubr.msk.f32.mxu0 %vm1982_vm0, %v1981_v0  ;;  %v93_v3 = vld [vmem:[%s2445_s2 + $0x10] sm:$0xff]  ;;  %v179_v4 = vld [vmem:[%s2444_s1] sm:$0xff]  ;;  %v92_v5 = vld [vmem:[%s2445_s2 + $0x8] sm:$0xff]  ;;  %vm102_vm1 = vcmask 261120   ;;  %vm191_vm3 = vcmask 64512   ;;  %vm578_vm4 = vcmask 318720  }
  0x27   :  { %1873 = vset.pattern.permute.xlu0 %v1983_v1  ;;  %1756 = vmatprep.subr.mxu1 %v1981_v0  ;;  %v91_v6 = vld [vmem:[%s2445_s2] sm:$0xff]  ;;  %v2110_v9 = vand.u32 127, %v176_v8  ;;  %v404_v19 = vld [vmem:[%s2450_s7 + $0x78] sm:$0xff]  ;;  %v189_v21 = vld [vmem:[%s2447_s4 + $0x8] sm:$0xff] }
  0x28   :  { %1758 = vmatprep.mubr.msk.f32.mxu1 %vm1982_vm0, %v1981_v0  ;;  %1746 = vmatpush3.msra.mxu0 %v94_v2  ;;  %v90_v7 = vld [vmem:[%s2443_s0] sm:$0xff]  ;;  %v388_v20 = vld [vmem:[%s2449_s6 + $0x78] sm:$0xff]  ;;  %v282_v22 = vld [vmem:[%s2448_s5 + $0x8] sm:$0xff] }
  0x29   :  { %1747 = vmatprep.subr.mxu0 %v1981_v0  ;;  %182 = vperm.xlu0 %1873, %v179_v4   ;;  %vm178_vm2 = vcmp.eq.s32.totalorder %v2110_v9, 39  ;;  %v1601_v11 = vld [vmem:[%s2446_s3] ss:$0 sm:$0xff]  ;;  %v403_v23 = vld [vmem:[%s2450_s7 + $0x70] sm:$0xff]  ;;  %v402_v27 = vld [vmem:[%s2450_s7 + $0x68] sm:$0xff] }
  0x2a   :  { %1748 = vmatpush3.msra.mxu0 %v93_v3  ;;  %v188_v17 = vld [vmem:[%s2447_s4] sm:$0xff]  ;;  %v387_v24 = vld [vmem:[%s2449_s6 + $0x70] sm:$0xff]  ;;  %v386_v28 = vld [vmem:[%s2449_s6 + $0x68] sm:$0xff] }
  0x2b   :  { %1749 = vmatprep.subr.mxu0 %v1981_v0  ;;  %v281_v18 = vld [vmem:[%s2448_s5] sm:$0xff]  ;;  %v190_v25 = vld [vmem:[%s2447_s4 + $0x10] sm:$0xff]  ;;  %v400_v31 = vld [vmem:[%s2450_s7 + $0x58] sm:$0xff] }
  0x2c   :  { %1750 = vmatpush3.msra.mxu0 %v92_v5  ;;  %v283_v26 = vld [vmem:[%s2448_s5 + $0x10] sm:$0xff]  ;;  %v401_v29 = vld [vmem:[%s2450_s7 + $0x60] sm:$0xff]  ;;  %v384_v32 = vld [vmem:[%s2449_s6 + $0x58] sm:$0xff] }
  0x2d   :  { %1751 = vmatprep.subr.mxu0 %v1981_v0  ;;  %v385_v30 = vld [vmem:[%s2449_s6 + $0x60] sm:$0xff]  ;;  %v399_v33 = vld [vmem:[%s2450_s7 + $0x50] sm:$0xff]  ;;  %v398_v35 = vld [vmem:[%s2450_s7 + $0x48] sm:$0xff] }
  0x2e   :  { %1752 = vmatpush3.msra.mxu0 %v91_v6  ;;  %v383_v34 = vld [vmem:[%s2449_s6 + $0x50] sm:$0xff]  ;;  %v382_v36 = vld [vmem:[%s2449_s6 + $0x48] sm:$0xff]  ;;  %v397_v37 = vld [vmem:[%s2450_s7 + $0x40] sm:$0xff] }
  0x2f   :  { %1754 = vmatmul.mubr.msk.f32.vlgmr.msra.gmra.mxu0 %vm102_vm1, %v90_v7  ;;  %1767 = vmatprep.subr.mxu0 %v1981_v0  ;;  %v381_v38 = vld [vmem:[%s2449_s6 + $0x40] sm:$0xff]  ;;  %v396_v39 = vld [vmem:[%s2450_s7 + $0x38] sm:$0xff]  ;;  %v395_v41 = vld [vmem:[%s2450_s7 + $0x30] sm:$0xff] }
  0x30   :  { %1769 = vmatprep.mubr.msk.f32.mxu0 %vm1982_vm0, %v1981_v0  ;;  %v380_v40 = vld [vmem:[%s2449_s6 + $0x38] sm:$0xff]  ;;  %v379_v42 = vld [vmem:[%s2449_s6 + $0x30] sm:$0xff]  ;;  %v394_v43 = vld [vmem:[%s2450_s7 + $0x28] sm:$0xff] }
  0x31   :  { %v378_v44 = vld [vmem:[%s2449_s6 + $0x28] sm:$0xff]  ;;  %v393_v45 = vld [vmem:[%s2450_s7 + $0x20] sm:$0xff]  ;;  %v392_v47 = vld [vmem:[%s2450_s7 + $0x18] sm:$0xff] }
  0x32   :  { %v377_v46 = vld [vmem:[%s2449_s6 + $0x20] sm:$0xff]  ;;  %v376_v48 = vld [vmem:[%s2449_s6 + $0x18] sm:$0xff]  ;;  %v391_v49 = vld [vmem:[%s2450_s7 + $0x10] sm:$0xff] }
  0x33   :  { %v375_v50 = vld [vmem:[%s2449_s6 + $0x10] sm:$0xff]  ;;  %v390_v51 = vld [vmem:[%s2450_s7 + $0x8] sm:$0xff]  ;;  %v389_v53 = vld [vmem:[%s2450_s7] sm:$0xff] }
  0x34   :  { %v374_v52 = vld [vmem:[%s2449_s6 + $0x8] sm:$0xff]  ;;  %v373_v54 = vld [vmem:[%s2449_s6] sm:$0xff]  ;;  %v920_v56 = vld [vmem:[#allocation4 + $0x1f8] sm:$0xff] }
  0x35   :  { %v918_v55 = vld [vmem:[#allocation4 + $0x1e8] sm:$0xff]  ;;  %v917_v57 = vld [vmem:[#allocation4 + $0x1e0] sm:$0xff]  ;;  %v919_v58 = vld [vmem:[#allocation4 + $0x1f0] sm:$0xff] }
  0x36   :  { %v916_v61 = vld [vmem:[#allocation4 + $0x1d8] sm:$0xff]  ;;  %v914_v2 = vld [vmem:[#allocation4 + $0x1c8] sm:$0xff]  ;;  %v913_v5 = vld [vmem:[#allocation4 + $0x1c0] sm:$0xff] }
  0x37   :  { %v915_v6 = vld [vmem:[#allocation4 + $0x1d0] sm:$0xff]  ;;  %v910_v7 = vld [vmem:[#allocation4 + $0x1a8] sm:$0xff] }
  0xa4   :  { %v183_v10 = vpop.permute.xlu0 %182 }
  0xa5   :  { %v185_v13 = vsel %vm178_vm2, %v183_v10, 0.0  ;;  %v912_v10 = vld [vmem:[#allocation4 + $0x1b8] sm:$0xff] }
  0xef   :  { %v172_v12 = vpop.f32.mrf.mxu0 }
  0xf0   :  { %v173_v14 = vadd.f32 %v1601_v11, %v172_v12  ;;  %v909_v12 = vld [vmem:[#allocation4 + $0x1a0] sm:$0xff] }
  0xf1   :  { %v1755_v15 = vpop.f32.mrf.mxu0 }
  0xf2   :  { %v186_v16 = vadd.f32 %v185_v13, %v173_v14  ;;  %v911_v14 = vld [vmem:[#allocation4 + $0x1b0] sm:$0xff] }
  0xf4   :  { %187 = vst [vmem:[%s2457_s14] sm:$0xff] %v186_v16  ;;  %1757 = vmatpush3.msra.mxu1 %v186_v16  ;;  %1768 = vmatpush3.msra.mxu0 %v186_v16  ;;  %v908_v16 = vld [vmem:[#allocation4 + $0x198] sm:$0xff] }
  0xf5   :  { %1759 = vmatmul.mubr.msk.f32.vlgmr.msra.gmra.mxu1 %vm191_vm3, %v188_v17  ;;  %1770 = vmatmul.mubr.msk.f32.vlgmr.msra.gmra.mxu0 %vm191_vm3, %v281_v18 }
  0xf6   :  { %1761 = vmatprep.mubr.msk.f32.mxu1 %vm1982_vm0, %v1981_v0  ;;  %1772 = vmatprep.mubr.msk.f32.mxu0 %vm1982_vm0, %v1981_v0 }
  0xf7   :  { %1778 = vmatprep.subr.mxu1 %v1981_v0  ;;  %1819 = vmatprep.subr.mxu0 %v1981_v0 }
  0xf8   :  { %1779 = vmatpush3.msra.mxu1 %v404_v19  ;;  %1820 = vmatpush3.msra.mxu0 %v388_v20  ;;  %v906_v19 = vld [vmem:[#allocation4 + $0x188] sm:$0xff]  ;;  %v905_v20 = vld [vmem:[#allocation4 + $0x180] sm:$0xff] }
  0xf9   :  { %1762 = vmatmul.mubr.msk.f32.gmra.mxu1 %vm191_vm3, %v189_v21  ;;  %1773 = vmatmul.mubr.msk.f32.gmra.mxu0 %vm191_vm3, %v282_v22  ;;  %v907_v21 = vld [vmem:[#allocation4 + $0x190] sm:$0xff] }
  0xfa   :  { %1764 = vmatprep.mubr.msk.f32.mxu1 %vm1982_vm0, %v1981_v0  ;;  %1775 = vmatprep.mubr.msk.f32.mxu0 %vm1982_vm0, %v1981_v0 }
  0xfb   :  { %1780 = vmatprep.subr.mxu1 %v1981_v0  ;;  %1821 = vmatprep.subr.mxu0 %v1981_v0 }
  0xfc   :  { %1781 = vmatpush3.msra.mxu1 %v403_v23  ;;  %1822 = vmatpush3.msra.mxu0 %v387_v24  ;;  %v902_v24 = vld [vmem:[#allocation4 + $0x168] sm:$0xff] }
  0xfd   :  { %1765 = vmatmul.mubr.msk.f32.gmra.mxu1 %vm191_vm3, %v190_v25  ;;  %1776 = vmatmul.mubr.msk.f32.gmra.mxu0 %vm191_vm3, %v283_v26  ;;  %v904_v25 = vld [vmem:[#allocation4 + $0x178] sm:$0xff]  ;;  %v901_v26 = vld [vmem:[#allocation4 + $0x160] sm:$0xff] }
  0xfe   :  { %1782 = vmatprep.subr.mxu1 %v1981_v0  ;;  %1823 = vmatprep.subr.mxu0 %v1981_v0 }
  0xff   :  { %1783 = vmatpush3.msra.mxu1 %v402_v27  ;;  %1824 = vmatpush3.msra.mxu0 %v386_v28 }
 0x100   :  { %1784 = vmatprep.subr.mxu1 %v1981_v0  ;;  %1825 = vmatprep.subr.mxu0 %v1981_v0 }
 0x101   :  { %1785 = vmatpush3.msra.mxu1 %v401_v29  ;;  %1826 = vmatpush3.msra.mxu0 %v385_v30  ;;  %v903_v29 = vld [vmem:[#allocation4 + $0x170] sm:$0xff]  ;;  %v898_v30 = vld [vmem:[#allocation4 + $0x148] sm:$0xff] }
 0x102   :  { %1786 = vmatprep.subr.mxu1 %v1981_v0  ;;  %1827 = vmatprep.subr.mxu0 %v1981_v0 }
 0x103   :  { %1787 = vmatpush3.msra.mxu1 %v400_v31  ;;  %1828 = vmatpush3.msra.mxu0 %v384_v32  ;;  %v900_v31 = vld [vmem:[#allocation4 + $0x158] sm:$0xff] }
 0x104   :  { %1788 = vmatprep.subr.mxu1 %v1981_v0  ;;  %1829 = vmatprep.subr.mxu0 %v1981_v0 }
 0x105   :  { %1789 = vmatpush3.msra.mxu1 %v399_v33  ;;  %1830 = vmatpush3.msra.mxu0 %v383_v34  ;;  %v897_v33 = vld [vmem:[#allocation4 + $0x140] sm:$0xff]  ;;  %v899_v34 = vld [vmem:[#allocation4 + $0x150] sm:$0xff] }
 0x106   :  { %1790 = vmatprep.subr.mxu1 %v1981_v0  ;;  %1831 = vmatprep.subr.mxu0 %v1981_v0 }
 0x107   :  { %1791 = vmatpush3.msra.mxu1 %v398_v35  ;;  %1832 = vmatpush3.msra.mxu0 %v382_v36  ;;  %v894_v35 = vld [vmem:[#allocation4 + $0x128] sm:$0xff]  ;;  %v896_v36 = vld [vmem:[#allocation4 + $0x138] sm:$0xff] }
 0x108   :  { %1792 = vmatprep.subr.mxu1 %v1981_v0  ;;  %1833 = vmatprep.subr.mxu0 %v1981_v0 }
 0x109   :  { %1793 = vmatpush3.msra.mxu1 %v397_v37  ;;  %1834 = vmatpush3.msra.mxu0 %v381_v38  ;;  %v893_v37 = vld [vmem:[#allocation4 + $0x120] sm:$0xff]  ;;  %v895_v38 = vld [vmem:[#allocation4 + $0x130] sm:$0xff] }
 0x10a   :  { %1794 = vmatprep.subr.mxu1 %v1981_v0  ;;  %1835 = vmatprep.subr.mxu0 %v1981_v0 }
 0x10b   :  { %1795 = vmatpush3.msra.mxu1 %v396_v39  ;;  %1836 = vmatpush3.msra.mxu0 %v380_v40  ;;  %v890_v39 = vld [vmem:[#allocation4 + $0x108] sm:$0xff]  ;;  %v892_v40 = vld [vmem:[#allocation4 + $0x118] sm:$0xff] }
 0x10c   :  { %1796 = vmatprep.subr.mxu1 %v1981_v0  ;;  %1837 = vmatprep.subr.mxu0 %v1981_v0 }
 0x10d   :  { %1797 = vmatpush3.msra.mxu1 %v395_v41  ;;  %1838 = vmatpush3.msra.mxu0 %v379_v42  ;;  %v889_v42 = vld [vmem:[#allocation4 + $0x100] sm:$0xff] }
 0x10e   :  { %1798 = vmatprep.subr.mxu1 %v1981_v0  ;;  %1839 = vmatprep.subr.mxu0 %v1981_v0 }
 0x10f   :  { %1799 = vmatpush3.msra.mxu1 %v394_v43  ;;  %1840 = vmatpush3.msra.mxu0 %v378_v44  ;;  %v891_v43 = vld [vmem:[#allocation4 + $0x110] sm:$0xff]  ;;  %v886_v44 = vld [vmem:[#allocation4 + $0xe8] sm:$0xff] }
 0x110   :  { %1800 = vmatprep.subr.mxu1 %v1981_v0  ;;  %1841 = vmatprep.subr.mxu0 %v1981_v0 }
 0x111   :  { %1801 = vmatpush3.msra.mxu1 %v393_v45  ;;  %1842 = vmatpush3.msra.mxu0 %v377_v46  ;;  %v888_v45 = vld [vmem:[#allocation4 + $0xf8] sm:$0xff]  ;;  %v885_v46 = vld [vmem:[#allocation4 + $0xe0] sm:$0xff] }
 0x112   :  { %1802 = vmatprep.subr.mxu1 %v1981_v0  ;;  %1843 = vmatprep.subr.mxu0 %v1981_v0 }
 0x113   :  { %1803 = vmatpush3.msra.mxu1 %v392_v47  ;;  %1844 = vmatpush3.msra.mxu0 %v376_v48  ;;  %v887_v47 = vld [vmem:[#allocation4 + $0xf0] sm:$0xff]  ;;  %v882_v48 = vld [vmem:[#allocation4 + $0xc8] sm:$0xff] }
 0x114   :  { %1804 = vmatprep.subr.mxu1 %v1981_v0  ;;  %1845 = vmatprep.subr.mxu0 %v1981_v0 }
 0x115   :  { %1805 = vmatpush3.msra.mxu1 %v391_v49  ;;  %1846 = vmatpush3.msra.mxu0 %v375_v50  ;;  %v884_v49 = vld [vmem:[#allocation4 + $0xd8] sm:$0xff] }
 0x116   :  { %1806 = vmatprep.subr.mxu1 %v1981_v0  ;;  %1847 = vmatprep.subr.mxu0 %v1981_v0 }
 0x117   :  { %1807 = vmatpush3.msra.mxu1 %v390_v51  ;;  %1848 = vmatpush3.msra.mxu0 %v374_v52  ;;  %v881_v51 = vld [vmem:[#allocation4 + $0xc0] sm:$0xff]  ;;  %v883_v52 = vld [vmem:[#allocation4 + $0xd0] sm:$0xff] }
 0x118   :  { %1808 = vmatprep.subr.mxu1 %v1981_v0  ;;  %1849 = vmatprep.subr.mxu0 %v1981_v0 }
 0x119   :  { %1809 = vmatpush3.msra.mxu1 %v389_v53  ;;  %1850 = vmatpush3.msra.mxu0 %v373_v54  ;;  %v878_v53 = vld [vmem:[#allocation4 + $0xa8] sm:$0xff]  ;;  %v880_v54 = vld [vmem:[#allocation4 + $0xb8] sm:$0xff] }
 0x11a   :  { %1810 = vmatprep.mubr.msk.f32.mxu1 %vm1982_vm0, %v1981_v0  ;;  %1851 = vmatprep.mubr.msk.f32.mxu0 %vm1982_vm0, %v1981_v0 }
 0x11b   :  { %921 = vmatprep.subr.mxu1 %v918_v55  ;;  %1004 = vmatprep.subr.mxu0 %v920_v56  ;;  %v877_v55 = vld [vmem:[#allocation4 + $0xa0] sm:$0xff]  ;;  %v879_v56 = vld [vmem:[#allocation4 + $0xb0] sm:$0xff] }
 0x1b5   :  { %v2283_v59 = vpop.f32.mrf.mxu1  ;;  %v2285_v60 = vpop.f32.mrf.mxu0 }
 0x1b6   :  { %1811 = vmatmul.mubr.f32.vlgmr.msra.gmra.mxu1 %v2285_v60  ;;  %1852 = vmatmul.mubr.f32.vlgmr.msra.gmra.mxu0 %v2283_v59  ;;  %v579_v62 = vsel %vm578_vm4, %v2283_v59, -inf  ;;  %v641_v63 = vsel %vm578_vm4, %v2285_v60, -inf  ;;  %vm575_vm1 = vcmp.eq.f32.partialorder %v2283_v59, %v2285_v60 }
 0x1b7   :  { %922 = vmatpush1.msra.mxu1 %v917_v57  ;;  %1005 = vmatpush1.msra.mxu0 %v919_v58  ;;  %v1760_v3 = vpop.f32.mrf.mxu1  ;;  %v1771_v4 = vpop.f32.mrf.mxu0  ;;  %v874_v57 = vld [vmem:[#allocation4 + $0x88] sm:$0xff]  ;;  %v876_v58 = vld [vmem:[#allocation4 + $0x98] sm:$0xff] }
 0x1b8   :  { %580 = vmax.xlane.f32.xlu0 %v579_v62  ;;  %1006 = vmatprep.subr.mxu0 %v916_v61  ;;  %v873_v61 = vld [vmem:[#allocation4 + $0x80] sm:$0xff]  ;;  %v875_v62 = vld [vmem:[#allocation4 + $0x90] sm:$0xff] }
 0x1b9   :  { %642 = vmax.xlane.f32.xlu1 %v641_v63  ;;  %923 = vmatprep.subr.mxu1 %v914_v2  ;;  %v2293_v11 = vpop.f32.mrf.mxu1  ;;  %v2295_v13 = vpop.f32.mrf.mxu0  ;;  %v870_v63 = vld [vmem:[#allocation4 + $0x68] sm:$0xff]  ;;  %v872_v2 = vld [vmem:[#allocation4 + $0x78] sm:$0xff]  ;;  %v869_v3 = vld [vmem:[#allocation4 + $0x60] sm:$0xff] }
 0x1ba   :  { %924 = vmatpush1.msra.mxu1 %v913_v5  ;;  %1007 = vmatpush1.msra.mxu0 %v915_v6  ;;  %v582_v15 = vsel %vm578_vm4, %v2293_v11, -inf  ;;  %v644_v32 = vsel %vm578_vm4, %v2295_v13, -inf  ;;  %v871_v4 = vld [vmem:[#allocation4 + $0x70] sm:$0xff]  ;;  %v866_v5 = vld [vmem:[#allocation4 + $0x48] sm:$0xff]  ;;  %v868_v6 = vld [vmem:[#allocation4 + $0x58] sm:$0xff] }
 0x1bb   :  { %925 = vmatprep.subr.mxu1 %v910_v7  ;;  %1008 = vmatprep.subr.mxu0 %v912_v10  ;;  %v1763_v17 = vpop.f32.mrf.mxu1  ;;  %v1774_v18 = vpop.f32.mrf.mxu0  ;;  %v865_v7 = vld [vmem:[#allocation4 + $0x40] sm:$0xff]  ;;  %v867_v10 = vld [vmem:[#allocation4 + $0x50] sm:$0xff] }
 0x1bc   :  { %1854 = vmatprep.mubr.msk.f32.mxu0 %vm1982_vm0, %v1981_v0  ;;  %926 = vmatpush1.msra.mxu1 %v909_v12  ;;  %v862_v12 = vld [vmem:[#allocation4 + $0x28] sm:$0xff]  ;;  %v860_v18 = vld [vmem:[#allocation4 + $0x18] sm:$0xff] }
 0x1bd   :  { %1009 = vmatpush1.msra.mxu0 %v911_v14  ;;  %583 = vmax.xlane.f32.xlu1 %v582_v15  ;;  %v2301_v22 = vpop.f32.mrf.mxu1  ;;  %v2303_v23 = vpop.f32.mrf.mxu0  ;;  %v864_v14 = vld [vmem:[#allocation4 + $0x38] sm:$0xff]  ;;  %v861_v15 = vld [vmem:[#allocation4 + $0x20] sm:$0xff]  ;;  %v858_v17 = vld [vmem:[#allocation4 + $0x8] sm:$0xff] }
 0x1be   :  { %1855 = vmatmul.mubr.f32.gmra.mxu0 %v2293_v11  ;;  %1010 = vmatprep.subr.mxu0 %v908_v16  ;;  %v585_v41 = vsel %vm578_vm4, %v2301_v22, -inf  ;;  %v647_v50 = vsel %vm578_vm4, %v2303_v23, -inf  ;;  %v863_v16 = vld [vmem:[#allocation4 + $0x30] sm:$0xff] }
 0x1bf   :  { %927 = vmatprep.subr.mxu1 %v906_v19  ;;  %1813 = vmatprep.mubr.msk.f32.mxu1 %vm1982_vm0, %v1981_v0  ;;  %v1766_v27 = vpop.f32.mrf.mxu1  ;;  %v1777_v28 = vpop.f32.mrf.mxu0  ;;  %v857_v19 = vld [vmem:[#allocation4] sm:$0xff] }
 0x1c0   :  { %928 = vmatpush1.msra.mxu1 %v905_v20  ;;  %1011 = vmatpush1.msra.mxu0 %v907_v21  ;;  %v859_v20 = vld [vmem:[#allocation4 + $0x10] sm:$0xff]  ;;  %v854_v21 = vld [vmem:[#allocation2 + $0x1e8] sm:$0xff]  ;;  %v852_v28 = vld [vmem:[#allocation2 + $0x1d8] sm:$0xff] }
 0x1c1   :  { %1814 = vmatmul.mubr.f32.gmra.mxu1 %v2295_v13  ;;  %929 = vmatprep.subr.mxu1 %v902_v24  ;;  %v856_v24 = vld [vmem:[#allocation2 + $0x1f8] sm:$0xff]  ;;  %v850_v27 = vld [vmem:[#allocation2 + $0x1c8] sm:$0xff] }
 0x1c2   :  { %1012 = vmatprep.subr.mxu0 %v904_v25  ;;  %930 = vmatpush1.msra.mxu1 %v901_v26  ;;  %v853_v25 = vld [vmem:[#allocation2 + $0x1e0] sm:$0xff]  ;;  %v855_v26 = vld [vmem:[#allocation2 + $0x1f0] sm:$0xff] }
 0x1c3   :  { %1013 = vmatpush1.msra.mxu0 %v903_v29  ;;  %931 = vmatprep.subr.mxu1 %v898_v30  ;;  %v849_v29 = vld [vmem:[#allocation2 + $0x1c0] sm:$0xff]  ;;  %v851_v30 = vld [vmem:[#allocation2 + $0x1d0] sm:$0xff] }
 0x1c4   :  { %1014 = vmatprep.subr.mxu0 %v900_v31  ;;  %645 = vmax.xlane.f32.xlu1 %v644_v32  ;;  %v846_v31 = vld [vmem:[#allocation2 + $0x1a8] sm:$0xff]  ;;  %v848_v32 = vld [vmem:[#allocation2 + $0x1b8] sm:$0xff] }
 0x1c5   :  { %932 = vmatpush1.msra.mxu1 %v897_v33  ;;  %1015 = vmatpush1.msra.mxu0 %v899_v34  ;;  %v845_v33 = vld [vmem:[#allocation2 + $0x1a0] sm:$0xff]  ;;  %v847_v34 = vld [vmem:[#allocation2 + $0x1b0] sm:$0xff] }
 0x1c6   :  { %933 = vmatprep.subr.mxu1 %v894_v35  ;;  %1016 = vmatprep.subr.mxu0 %v896_v36  ;;  %v842_v35 = vld [vmem:[#allocation2 + $0x188] sm:$0xff]  ;;  %v844_v36 = vld [vmem:[#allocation2 + $0x198] sm:$0xff] }
 0x1c7   :  { %1857 = vmatprep.mubr.msk.f32.mxu0 %vm1982_vm0, %v1981_v0  ;;  %934 = vmatpush1.msra.mxu1 %v893_v37  ;;  %v841_v37 = vld [vmem:[#allocation2 + $0x180] sm:$0xff] }
 0x1c8   :  { %1017 = vmatpush1.msra.mxu0 %v895_v38  ;;  %935 = vmatprep.subr.mxu1 %v890_v39  ;;  %v843_v38 = vld [vmem:[#allocation2 + $0x190] sm:$0xff]  ;;  %v838_v39 = vld [vmem:[#allocation2 + $0x168] sm:$0xff] }
 0x1c9   :  { %1858 = vmatmul.mubr.f32.gmra.mxu0 %v2301_v22  ;;  %1018 = vmatprep.subr.mxu0 %v892_v40  ;;  %v840_v40 = vld [vmem:[#allocation2 + $0x178] sm:$0xff] }
 0x1ca   :  { %586 = vmax.xlane.f32.xlu1 %v585_v41  ;;  %1816 = vmatprep.mubr.msk.f32.mxu1 %vm1982_vm0, %v1981_v0  ;;  %v837_v41 = vld [vmem:[#allocation2 + $0x160] sm:$0xff] }
 0x1cb   :  { %936 = vmatpush1.msra.mxu1 %v889_v42  ;;  %1019 = vmatpush1.msra.mxu0 %v891_v43  ;;  %v839_v42 = vld [vmem:[#allocation2 + $0x170] sm:$0xff]  ;;  %v834_v43 = vld [vmem:[#allocation2 + $0x148] sm:$0xff] }
 0x1cc   :  { %1817 = vmatmul.mubr.f32.gmra.mxu1 %v2303_v23  ;;  %937 = vmatprep.subr.mxu1 %v886_v44  ;;  %v836_v44 = vld [vmem:[#allocation2 + $0x158] sm:$0xff] }
 0x1cd   :  { %1020 = vmatprep.subr.mxu0 %v888_v45  ;;  %938 = vmatpush1.msra.mxu1 %v885_v46  ;;  %v833_v45 = vld [vmem:[#allocation2 + $0x140] sm:$0xff]  ;;  %v835_v46 = vld [vmem:[#allocation2 + $0x150] sm:$0xff] }
 0x1ce   :  { %1021 = vmatpush1.msra.mxu0 %v887_v47  ;;  %939 = vmatprep.subr.mxu1 %v882_v48  ;;  %v830_v47 = vld [vmem:[#allocation2 + $0x128] sm:$0xff]  ;;  %v832_v48 = vld [vmem:[#allocation2 + $0x138] sm:$0xff] }
 0x1cf   :  { %1022 = vmatprep.subr.mxu0 %v884_v49  ;;  %648 = vmax.xlane.f32.xlu1 %v647_v50  ;;  %v831_v49 = vld [vmem:[#allocation2 + $0x130] sm:$0xff]  ;;  %v829_v50 = vld [vmem:[#allocation2 + $0x120] sm:$0xff] }
 0x1d0   :  { %940 = vmatpush1.msra.mxu1 %v881_v51  ;;  %1023 = vmatpush1.msra.mxu0 %v883_v52  ;;  %v828_v51 = vld [vmem:[#allocation2 + $0x118] sm:$0xff]  ;;  %v826_v52 = vld [vmem:[#allocation2 + $0x108] sm:$0xff] }
 0x1d1   :  { %941 = vmatprep.subr.mxu1 %v878_v53  ;;  %1024 = vmatprep.subr.mxu0 %v880_v54  ;;  %v827_v53 = vld [vmem:[#allocation2 + $0x110] sm:$0xff]  ;;  %v825_v54 = vld [vmem:[#allocation2 + $0x100] sm:$0xff] }
 0x1d2   :  { %942 = vmatpush1.msra.mxu1 %v877_v55  ;;  %1025 = vmatpush1.msra.mxu0 %v879_v56  ;;  %v824_v55 = vld [vmem:[#allocation2 + $0xf8] sm:$0xff]  ;;  %v822_v56 = vld [vmem:[#allocation2 + $0xe8] sm:$0xff] }
 0x1d3   :  { %943 = vmatprep.subr.mxu1 %v874_v57  ;;  %1026 = vmatprep.subr.mxu0 %v876_v58  ;;  %v823_v57 = vld [vmem:[#allocation2 + $0xf0] sm:$0xff]  ;;  %v821_v58 = vld [vmem:[#allocation2 + $0xe0] sm:$0xff] }
 0x1d4   :  { %944 = vmatpush1.msra.mxu1 %v873_v61  ;;  %1027 = vmatpush1.msra.mxu0 %v875_v62  ;;  %v820_v61 = vld [vmem:[#allocation2 + $0xd8] sm:$0xff]  ;;  %v818_v62 = vld [vmem:[#allocation2 + $0xc8] sm:$0xff] }
 0x1d5   :  { %945 = vmatprep.subr.mxu1 %v870_v63  ;;  %1028 = vmatprep.subr.mxu0 %v872_v2  ;;  %v819_v63 = vld [vmem:[#allocation2 + $0xd0] sm:$0xff]  ;;  %v817_v2 = vld [vmem:[#allocation2 + $0xc0] sm:$0xff] }
 0x1d6   :  { %946 = vmatpush1.msra.mxu1 %v869_v3  ;;  %1029 = vmatpush1.msra.mxu0 %v871_v4  ;;  %v816_v3 = vld [vmem:[#allocation2 + $0xb8] sm:$0xff]  ;;  %v814_v4 = vld [vmem:[#allocation2 + $0xa8] sm:$0xff] }
 0x1d7   :  { %947 = vmatprep.subr.mxu1 %v866_v5  ;;  %1030 = vmatprep.subr.mxu0 %v868_v6  ;;  %v815_v5 = vld [vmem:[#allocation2 + $0xb0] sm:$0xff]  ;;  %v813_v6 = vld [vmem:[#allocation2 + $0xa0] sm:$0xff] }
 0x1d8   :  { %948 = vmatpush1.msra.mxu1 %v865_v7  ;;  %1031 = vmatpush1.msra.mxu0 %v867_v10  ;;  %v812_v7 = vld [vmem:[#allocation2 + $0x98] sm:$0xff]  ;;  %v810_v10 = vld [vmem:[#allocation2 + $0x88] sm:$0xff] }
 0x1d9   :  { %949 = vmatprep.subr.mxu1 %v862_v12  ;;  %1032 = vmatprep.subr.mxu0 %v864_v14  ;;  %v811_v12 = vld [vmem:[#allocation2 + $0x90] sm:$0xff]  ;;  %v809_v14 = vld [vmem:[#allocation2 + $0x80] sm:$0xff] }
 0x1da   :  { %950 = vmatpush1.msra.mxu1 %v861_v15  ;;  %1033 = vmatpush1.msra.mxu0 %v863_v16  ;;  %v808_v15 = vld [vmem:[#allocation2 + $0x78] sm:$0xff]  ;;  %v806_v16 = vld [vmem:[#allocation2 + $0x68] sm:$0xff] }
 0x1db   :  { %951 = vmatprep.subr.mxu1 %v858_v17  ;;  %1034 = vmatprep.subr.mxu0 %v860_v18  ;;  %v807_v17 = vld [vmem:[#allocation2 + $0x70] sm:$0xff]  ;;  %v805_v18 = vld [vmem:[#allocation2 + $0x60] sm:$0xff] }
 0x1dc   :  { %952 = vmatpush1.msra.mxu1 %v857_v19  ;;  %985 = vmatprep.mubr.f32.mxu1 %v1981_v0  ;;  %v804_v19 = vld [vmem:[#allocation2 + $0x58] sm:$0xff] }
 0x1dd   :  { %1035 = vmatpush1.msra.mxu0 %v859_v20  ;;  %1068 = vmatprep.mubr.f32.mxu0 %v1981_v0  ;;  %v802_v20 = vld [vmem:[#allocation2 + $0x48] sm:$0xff] }
 0x1de   :  { %986 = vmatmul.mubr.f32.vlgmr.msra.gmra.mxu1 %v2285_v60  ;;  %1069 = vmatmul.mubr.f32.vlgmr.msra.gmra.mxu0 %v2285_v60 }
 0x1df   :  { %1087 = vmatprep.subr.mxu1 %v854_v21  ;;  %1170 = vmatprep.subr.mxu0 %v856_v24  ;;  %v803_v21 = vld [vmem:[#allocation2 + $0x50] sm:$0xff]  ;;  %v801_v24 = vld [vmem:[#allocation2 + $0x40] sm:$0xff] }
 0x1e0   :  { %1088 = vmatpush1.msra.mxu1 %v853_v25  ;;  %1171 = vmatpush1.msra.mxu0 %v855_v26  ;;  %v800_v25 = vld [vmem:[#allocation2 + $0x38] sm:$0xff]  ;;  %v798_v26 = vld [vmem:[#allocation2 + $0x28] sm:$0xff] }
 0x1e1   :  { %1089 = vmatprep.subr.mxu1 %v850_v27  ;;  %1172 = vmatprep.subr.mxu0 %v852_v28  ;;  %v799_v27 = vld [vmem:[#allocation2 + $0x30] sm:$0xff]  ;;  %v797_v28 = vld [vmem:[#allocation2 + $0x20] sm:$0xff] }
 0x1e2   :  { %991 = vmatprep.mubr.f32.mxu1 %v1981_v0  ;;  %1074 = vmatprep.mubr.f32.mxu0 %v1981_v0 }
 0x1e3   :  { %1090 = vmatpush1.msra.mxu1 %v849_v29  ;;  %1173 = vmatpush1.msra.mxu0 %v851_v30  ;;  %v796_v29 = vld [vmem:[#allocation2 + $0x18] sm:$0xff]  ;;  %v794_v30 = vld [vmem:[#allocation2 + $0x8] sm:$0xff] }
 0x1e4   :  { %992 = vmatmul.mubr.f32.gmra.mxu1 %v2295_v13  ;;  %1075 = vmatmul.mubr.f32.gmra.mxu0 %v2295_v13 }
 0x1e5   :  { %1091 = vmatprep.subr.mxu1 %v846_v31  ;;  %1174 = vmatprep.subr.mxu0 %v848_v32  ;;  %v793_v31 = vld [vmem:[#allocation2] sm:$0xff]  ;;  %v795_v32 = vld [vmem:[#allocation2 + $0x10] sm:$0xff] }
 0x1e6   :  { %1092 = vmatpush1.msra.mxu1 %v845_v33  ;;  %1175 = vmatpush1.msra.mxu0 %v847_v34 }
 0x1e7   :  { %1093 = vmatprep.subr.mxu1 %v842_v35  ;;  %1176 = vmatprep.subr.mxu0 %v844_v36 }
 0x1e8   :  { %997 = vmatprep.mubr.f32.mxu1 %v1981_v0  ;;  %1080 = vmatprep.mubr.f32.mxu0 %v1981_v0 }
 0x1e9   :  { %1094 = vmatpush1.msra.mxu1 %v841_v37  ;;  %1177 = vmatpush1.msra.mxu0 %v843_v38 }
 0x1ea   :  { %998 = vmatmul.mubr.f32.gmra.mxu1 %v2303_v23  ;;  %1081 = vmatmul.mubr.f32.gmra.mxu0 %v2303_v23 }
 0x1eb   :  { %1095 = vmatprep.subr.mxu1 %v838_v39  ;;  %1178 = vmatprep.subr.mxu0 %v840_v40 }
 0x1ec   :  { %1096 = vmatpush1.msra.mxu1 %v837_v41  ;;  %1179 = vmatpush1.msra.mxu0 %v839_v42 }
 0x1ed   :  { %1097 = vmatprep.subr.mxu1 %v834_v43  ;;  %1180 = vmatprep.subr.mxu0 %v836_v44 }
 0x1ee   :  { %1098 = vmatpush1.msra.mxu1 %v833_v45  ;;  %1181 = vmatpush1.msra.mxu0 %v835_v46 }
 0x1ef   :  { %1099 = vmatprep.subr.mxu1 %v830_v47  ;;  %1182 = vmatprep.subr.mxu0 %v832_v48 }
 0x1f0   :  { %1183 = vmatpush1.msra.mxu0 %v831_v49  ;;  %591 = vrot.lane.b32.xlu1 %v2110_v9, %s1977_s24 }
 0x1f1   :  { %1100 = vmatpush1.msra.mxu1 %v829_v50  ;;  %1184 = vmatprep.subr.mxu0 %v828_v51 }
 0x1f2   :  { %1101 = vmatprep.subr.mxu1 %v826_v52  ;;  %1185 = vmatpush1.msra.mxu0 %v827_v53 }
 0x1f3   :  { %1102 = vmatpush1.msra.mxu1 %v825_v54  ;;  %1186 = vmatprep.subr.mxu0 %v824_v55 }
 0x1f4   :  { %1103 = vmatprep.subr.mxu1 %v822_v56  ;;  %1187 = vmatpush1.msra.mxu0 %v823_v57 }
 0x1f5   :  { %1104 = vmatpush1.msra.mxu1 %v821_v58  ;;  %1188 = vmatprep.subr.mxu0 %v820_v61 }
 0x1f6   :  { %1105 = vmatprep.subr.mxu1 %v818_v62  ;;  %1189 = vmatpush1.msra.mxu0 %v819_v63 }
 0x1f7   :  { %1106 = vmatpush1.msra.mxu1 %v817_v2  ;;  %1190 = vmatprep.subr.mxu0 %v816_v3 }
 0x1f8   :  { %1107 = vmatprep.subr.mxu1 %v814_v4  ;;  %1191 = vmatpush1.msra.mxu0 %v815_v5 }
 0x1f9   :  { %1108 = vmatpush1.msra.mxu1 %v813_v6  ;;  %1192 = vmatprep.subr.mxu0 %v812_v7 }
 0x1fa   :  { %1109 = vmatprep.subr.mxu1 %v810_v10  ;;  %1193 = vmatpush1.msra.mxu0 %v811_v12 }
 0x1fb   :  { %1110 = vmatpush1.msra.mxu1 %v809_v14  ;;  %1194 = vmatprep.subr.mxu0 %v808_v15 }
 0x1fc   :  { %1111 = vmatprep.subr.mxu1 %v806_v16  ;;  %1195 = vmatpush1.msra.mxu0 %v807_v17 }
 0x1fd   :  { %1112 = vmatpush1.msra.mxu1 %v805_v18  ;;  %1196 = vmatprep.subr.mxu0 %v804_v19 }
 0x1fe   :  { %1113 = vmatprep.subr.mxu1 %v802_v20  ;;  %1197 = vmatpush1.msra.mxu0 %v803_v21 }
 0x1ff   :  { %1114 = vmatpush1.msra.mxu1 %v801_v24  ;;  %1198 = vmatprep.subr.mxu0 %v800_v25 }
 0x200   :  { %1115 = vmatprep.subr.mxu1 %v798_v26  ;;  %1199 = vmatpush1.msra.mxu0 %v799_v27 }
 0x201   :  { %1116 = vmatpush1.msra.mxu1 %v797_v28  ;;  %1200 = vmatprep.subr.mxu0 %v796_v29 }
 0x202   :  { %1117 = vmatprep.subr.mxu1 %v794_v30  ;;  %1151 = vmatprep.mubr.f32.mxu1 %v1981_v0 }
 0x203   :  { %1118 = vmatpush1.msra.mxu1 %v793_v31  ;;  %1201 = vmatpush1.msra.mxu0 %v795_v32 }
 0x204   :  { %1234 = vmatprep.mubr.f32.mxu0 %v1981_v0  ;;  %1152 = vmatmul.mubr.f32.vlgmr.msra.gmra.mxu1 %v2283_v59 }
 0x205   :  { %1235 = vmatmul.mubr.f32.vlgmr.msra.gmra.mxu0 %v2283_v59  ;;  %1157 = vmatprep.mubr.f32.mxu1 %v1981_v0 }
 0x206   :  { %1240 = vmatprep.mubr.f32.mxu0 %v1981_v0 }
 0x208   :  { %1158 = vmatmul.mubr.f32.gmra.mxu1 %v2293_v11 }
 0x209   :  { %1241 = vmatmul.mubr.f32.gmra.mxu0 %v2293_v11  ;;  %1163 = vmatprep.mubr.f32.mxu1 %v1981_v0 }
 0x20a   :  { %1246 = vmatprep.mubr.f32.mxu0 %v1981_v0 }
 0x20c   :  { %1164 = vmatmul.mubr.f32.gmra.mxu1 %v2301_v22 }
 0x20d   :  { %1247 = vmatmul.mubr.f32.gmra.mxu0 %v2301_v22 }
 0x241   :  { %v581_v38 = vpop.xlane.xlu0 %580 }
 0x242   :  { %v643_v33 = vpop.xlane.xlu1 %642  ;;  %vm588_vm5 = vcmp.ge.f32.partialorder %v2283_v59, %v581_v38 }
 0x243   :  { %vm650_vm6 = vcmp.ge.f32.partialorder %v2285_v60, %v643_v33 }
 0x246   :  { %v584_v34 = vpop.xlane.xlu1 %583 }
 0x247   :  { %vm589_vm7 = vcmp.ge.f32.partialorder %v2293_v11, %v584_v34 }
 0x24d   :  { %v646_v35 = vpop.xlane.xlu1 %645 }
 0x24e   :  { %vm651_vm8 = vcmp.ge.f32.partialorder %v2295_v13, %v646_v35 }
 0x253   :  { %v587_v36 = vpop.xlane.xlu1 %586 }
 0x254   :  { %vm590_vm9 = vcmp.ge.f32.partialorder %v2301_v22, %v587_v36 }
 0x258   :  { %v649_v37 = vpop.xlane.xlu1 %648 }
 0x259   :  { %vm652_vm10 = vcmp.ge.f32.partialorder %v2303_v23, %v649_v37 }
 0x262   :  { %v592_v39 = vpop.permute.xlu1 %591 }
 0x263   :  { %v653_v40 = vsel %vm650_vm6, %v592_v39, 7  ;;  %v593_v41 = vsel %vm588_vm5, %v592_v39, 7  ;;  %v594_v42 = vsel %vm589_vm7, %v592_v39, 7  ;;  %v654_v48 = vsel %vm651_vm8, %v592_v39, 7 }
 0x264   :  { %v656_v43 = vsel %vm578_vm4, %v653_v40, 2147483647  ;;  %v596_v44 = vsel %vm578_vm4, %v593_v41, 2147483647  ;;  %v611_v45 = vsel %vm578_vm4, %v594_v42, 2147483647  ;;  %vm576_vm7 = vcmp.eq.f32.partialorder %v2293_v11, %v2295_v13 }
 0x265   :  { %v658_v46 = vshra.s32 %v656_v43, 16  ;;  %v598_v47 = vshra.s32 %v596_v44, 16  ;;  %v613_v51 = vshra.s32 %v611_v45, 16  ;;  %v671_v52 = vsel %vm578_vm4, %v654_v48, 2147483647 }
 0x266   :  { %v595_v53 = vsel %vm590_vm9, %v592_v39, 7  ;;  %v673_v55 = vshra.s32 %v671_v52, 16  ;;  %v655_v57 = vsel %vm652_vm10, %v592_v39, 7  ;;  %v597_v25 = vand.u32 65535, %v596_v44 }
 0x267   :  { %v660_v49 = vcvt.s32.f32 %v658_v46  ;;  %v600_v50 = vcvt.s32.f32 %v598_v47  ;;  %v615_v54 = vcvt.s32.f32 %v613_v51  ;;  %v626_v56 = vsel %vm578_vm4, %v595_v53, 2147483647 }
 0x268   :  { %v675_v58 = vcvt.s32.f32 %v673_v55  ;;  %v628_v61 = vshra.s32 %v626_v56, 16  ;;  %v686_v62 = vsel %vm578_vm4, %v655_v57, 2147483647  ;;  %v599_v28 = vcvt.s32.f32 %v597_v25 }
 0x269   :  { %661 = vmin.xlane.f32.xlu1 %v660_v49  ;;  %601 = vmin.xlane.f32.xlu0 %v600_v50  ;;  %v688_v2 = vshra.s32 %v686_v62, 16  ;;  %v657_v29 = vand.u32 65535, %v656_v43  ;;  %v612_v33 = vand.u32 65535, %v611_v45  ;;  %v672_v37 = vand.u32 65535, %v671_v52 }
 0x26a   :  { %v630_v63 = vcvt.s32.f32 %v628_v61  ;;  %v687_v41 = vand.u32 65535, %v686_v62  ;;  %v627_v42 = vand.u32 65535, %v626_v56  ;;  %vm1985_vm4 = vmmov 1  }
 0x26b   :  { %v690_v5 = vcvt.s32.f32 %v688_v2  ;;  %v659_v32 = vcvt.s32.f32 %v657_v29  ;;  %v614_v36 = vcvt.s32.f32 %v612_v33  ;;  %v674_v40 = vcvt.s32.f32 %v672_v37 }
 0x26c   :  { %v689_v46 = vcvt.s32.f32 %v687_v41  ;;  %v629_v47 = vcvt.s32.f32 %v627_v42 }
 0x26d   :  { %616 = vmin.xlane.f32.xlu0 %v615_v54 }
 0x271   :  { %676 = vmin.xlane.f32.xlu0 %v675_v58 }
 0x275   :  { %631 = vmin.xlane.f32.xlu0 %v630_v63 }
 0x276   :  { %v471_v3 = vpop.f32.mrf.mxu1  ;;  %v551_v4 = vpop.f32.mrf.mxu0 }
 0x277   :  { %v2359_v6 = vadd.f32 %v551_v4, %v471_v3 }
 0x278   :  { %v1812_v7 = vpop.f32.mrf.mxu1  ;;  %v1853_v10 = vpop.f32.mrf.mxu0 }
 0x279   :  { %691 = vmin.xlane.f32.xlu0 %v690_v5 }
 0x27e   :  { %v556_v12 = vpop.f32.mrf.mxu0 }
 0x280   :  { %v1856_v14 = vpop.f32.mrf.mxu0 }
 0x281   :  { %v476_v15 = vpop.f32.mrf.mxu1 }
 0x282   :  { %v2361_v16 = vadd.f32 %v556_v12, %v476_v15 }
 0x283   :  { %v1815_v17 = vpop.f32.mrf.mxu1 }
 0x289   :  { %v561_v18 = vpop.f32.mrf.mxu0 }
 0x28b   :  { %v1859_v19 = vpop.f32.mrf.mxu0 }
 0x28c   :  { %v481_v20 = vpop.f32.mrf.mxu1 }
 0x28d   :  { %v2363_v21 = vadd.f32 %v561_v18, %v481_v20 }
 0x28e   :  { %v1818_v24 = vpop.f32.mrf.mxu1 }
 0x2f2   :  { %v662_v26 = vpop.xlane.xlu1 %661  ;;  %v602_v27 = vpop.xlane.xlu0 %601 }
 0x2f3   :  { %vm603_vm11 = vcmp.eq.f32.partialorder %v600_v50, %v602_v27  ;;  %vm663_vm12 = vcmp.eq.f32.partialorder %v660_v49, %v662_v26  ;;  %v1984_v49 = vmov 39   ;;  %v668_v51 = vcvt.f32.s32 %v662_v26 }
 0x2f4   :  { %v604_v30 = vsel %vm603_vm11, %v599_v28, inf  ;;  %v664_v34 = vsel %vm663_vm12, %v659_v32, inf  ;;  %1874 = vset.pattern.permute.xlu0 %v1984_v49  ;;  %1880 = vset.pattern.permute.xlu1 %v1984_v49  ;;  %v608_v52 = vcvt.f32.s32 %v602_v27  ;;  %vm577_vm12 = vcmp.eq.f32.partialorder %v2301_v22, %v2303_v23  ;;  %v1609_v22 = vld [vmem:[%s2451_s8] ss:$0 sm:$0xff] }
 0x2f5   :  { %605 = vmin.xlane.f32.xlu0 %v604_v30  ;;  %v669_v55 = vshll.u32 %v668_v51, 16  ;;  %v572_v37 = vadd.f32 %v1609_v22, %v2359_v6 }
 0x2f6   :  { %v617_v31 = vpop.xlane.xlu0 %616  ;;  %v609_v56 = vshll.u32 %v608_v52, 16 }
 0x2f7   :  { %vm618_vm13 = vcmp.eq.f32.partialorder %v615_v54, %v617_v31  ;;  %v623_v62 = vcvt.f32.s32 %v617_v31 }
 0x2f8   :  { %v619_v38 = vsel %vm618_vm13, %v614_v36, inf }
 0x2f9   :  { %665 = vmin.xlane.f32.xlu0 %v664_v34 }
 0x2fa   :  { %v677_v35 = vpop.xlane.xlu0 %676 }
 0x2fb   :  { %vm678_vm14 = vcmp.eq.f32.partialorder %v675_v58, %v677_v35  ;;  %v683_v2 = vcvt.f32.s32 %v677_v35 }
 0x2fc   :  { %v679_v43 = vsel %vm678_vm14, %v674_v40, inf }
 0x2fd   :  { %620 = vmin.xlane.f32.xlu0 %v619_v38  ;;  %v684_v12 = vshll.u32 %v683_v2, 16 }
 0x2fe   :  { %v632_v39 = vpop.xlane.xlu0 %631 }
 0x2ff   :  { %vm633_vm15 = vcmp.eq.f32.partialorder %v630_v63, %v632_v39  ;;  %v638_v7 = vcvt.f32.s32 %v632_v39 }
 0x300   :  { %v634_v48 = vsel %vm633_vm15, %v629_v47, inf }
 0x301   :  { %680 = vmin.xlane.f32.xlu0 %v679_v43  ;;  %v639_v60 = vshll.u32 %v638_v7, 16 }
 0x302   :  { %v692_v44 = vpop.xlane.xlu0 %691 }
 0x303   :  { %vm693_vm0 = vcmp.eq.f32.partialorder %v690_v5, %v692_v44  ;;  %v624_v5 = vshll.u32 %v623_v62, 16  ;;  %v698_v14 = vcvt.f32.s32 %v692_v44  ;;  %v573_v44 = vadd.f32 %v1609_v22, %v2361_v16 }
 0x304   :  { %v694_v45 = vsel %vm693_vm0, %v689_v46, inf }
 0x305   :  { %695 = vmin.xlane.f32.xlu1 %v694_v45  ;;  %635 = vmin.xlane.f32.xlu0 %v634_v48  ;;  %v699_v25 = vshll.u32 %v698_v14, 16  ;;  %v1408_v14 = vld [vmem:[#allocation6 + $0x1f8] sm:$0xff] }
 0x306   :  { %1704 = vmatprep.subr.mxu0 %v1408_v14 }
 0x37e   :  { %v606_v50 = vpop.xlane.xlu0 %605 }
 0x37f   :  { %v607_v53 = vcvt.f32.s32 %v606_v50  ;;  %v574_v50 = vadd.f32 %v1609_v22, %v2363_v21  ;;  %v1355_v22 = vld [vmem:[#allocation6 + $0x50] sm:$0xff] }
 0x381   :  { %v610_v58 = vadd.s32 %v609_v56, %v607_v53 }
 0x382   :  { %v666_v54 = vpop.xlane.xlu0 %665 }
 0x383   :  { %v667_v57 = vcvt.f32.s32 %v666_v54 }
 0x385   :  { %v670_v61 = vadd.s32 %v669_v55, %v667_v57 }
 0x386   :  { %v621_v63 = vpop.xlane.xlu0 %620 }
 0x387   :  { %vm701_vm2 = vcmp.eq.s32.totalorder %v610_v58, %v670_v61  ;;  %v622_v3 = vcvt.f32.s32 %v621_v63 }
 0x388   :  { %vm704_vm3 = vmand %vm575_vm1, %vm701_vm2 }
 0x389   :  { %vm710_vm5 = vmxor %vm701_vm2, %vm1985_vm4  ;;  %v707_v4 = vsel %vm704_vm3, 1.0, %v1981_v0  ;;  %v625_v19 = vadd.s32 %v624_v5, %v622_v3  ;;  %vm759_vm2 = vcmask 15360  }
 0x38a   :  { %v681_v10 = vpop.xlane.xlu0 %680  ;;  %vm713_vm6 = vmand %vm575_vm1, %vm710_vm5  ;;  %vm719_vm1 = vcmp.eq.s32.totalorder %v2110_v9, 0 }
 0x38b   :  { %v682_v15 = vcvt.f32.s32 %v681_v10  ;;  %v716_v17 = vsel %vm713_vm6, 1.0, %v1981_v0  ;;  %v1986_v10 = vmov 1  }
 0x38c   :  { %v1875_v18 = vpack.i.bf16 %v716_v17, %v707_v4  ;;  %v1392_v17 = vld [vmem:[#allocation6 + $0x178] sm:$0xff] }
 0x38d   :  { %v685_v59 = vadd.s32 %v684_v12, %v682_v15  ;;  %v1376_v12 = vld [vmem:[#allocation6 + $0xf8] sm:$0xff]  ;;  %1705 = vmatpush3.msra.mxu0 %v1392_v17 }
 0x38e   :  { %1876 = vperm.xlu0 %1874, %v1875_v18   ;;  %v696_v20 = vpop.xlane.xlu1 %695  ;;  %v636_v24 = vpop.xlane.xlu0 %635  ;;  %v1360_v15 = vld [vmem:[#allocation6 + $0x78] sm:$0xff]  ;;  %1663 = vmatprep.subr.mxu1 %v1376_v12  ;;  %v1375_v18 = vld [vmem:[#allocation6 + $0xf0] sm:$0xff] }
 0x38f   :  { %vm702_vm8 = vcmp.eq.s32.totalorder %v625_v19, %v685_v59  ;;  %v697_v26 = vcvt.f32.s32 %v696_v20  ;;  %v637_v27 = vcvt.f32.s32 %v636_v24  ;;  %v1407_v19 = vld [vmem:[#allocation6 + $0x1f0] sm:$0xff]  ;;  %1664 = vmatpush3.msra.mxu1 %v1360_v15  ;;  %v1374_v20 = vld [vmem:[#allocation6 + $0xe8] sm:$0xff] }
 0x390   :  { %vm705_vm9 = vmand %vm576_vm7, %vm702_vm8  ;;  %v1359_v59 = vld [vmem:[#allocation6 + $0x70] sm:$0xff]  ;;  %1665 = vmatprep.subr.mxu1 %v1375_v18  ;;  %1706 = vmatprep.subr.mxu0 %v1407_v19  ;;  %v1406_v24 = vld [vmem:[#allocation6 + $0x1e8] sm:$0xff] }
 0x391   :  { %vm711_vm10 = vmxor %vm702_vm8, %vm1985_vm4  ;;  %v700_v28 = vadd.s32 %v699_v25, %v697_v26  ;;  %v640_v29 = vadd.s32 %v639_v60, %v637_v27  ;;  %v708_v30 = vsel %vm705_vm9, 1.0, %v1981_v0  ;;  %v1391_v60 = vld [vmem:[#allocation6 + $0x170] sm:$0xff]  ;;  %v1358_v25 = vld [vmem:[#allocation6 + $0x68] sm:$0xff]  ;;  %1666 = vmatpush3.msra.mxu1 %v1359_v59 }
 0x392   :  { %vm714_vm11 = vmand %vm576_vm7, %vm711_vm10  ;;  %1891 = vset.pattern.permute.xlu0 %v1983_v1  ;;  %v1390_v26 = vld [vmem:[#allocation6 + $0x168] sm:$0xff]  ;;  %1707 = vmatpush3.msra.mxu0 %v1391_v60  ;;  %v1373_v27 = vld [vmem:[#allocation6 + $0xe0] sm:$0xff] }
 0x393   :  { %vm703_vm13 = vcmp.eq.s32.totalorder %v640_v29, %v700_v28  ;;  %v717_v11 = vsel %vm714_vm11, 1.0, %v1981_v0  ;;  %v1405_v28 = vld [vmem:[#allocation6 + $0x1e0] sm:$0xff]  ;;  %1667 = vmatprep.subr.mxu1 %v1374_v20  ;;  %1708 = vmatprep.subr.mxu0 %v1406_v24  ;;  %v1346_v18 = vld [vmem:[#allocation6 + $0x8] sm:$0xff] }
 0x394   :  { %vm706_vm14 = vmand %vm577_vm12, %vm703_vm13  ;;  %v1881_v13 = vpack.i.bf16 %v717_v11, %v708_v30  ;;  %v1357_v29 = vld [vmem:[#allocation6 + $0x60] sm:$0xff]  ;;  %1668 = vmatpush3.msra.mxu1 %v1358_v25  ;;  %1709 = vmatpush3.msra.mxu0 %v1390_v26  ;;  %v1372_v11 = vld [vmem:[#allocation6 + $0xd8] sm:$0xff] }
 0x395   :  { %vm712_vm15 = vmxor %vm703_vm13, %vm1985_vm4  ;;  %v709_v31 = vsel %vm706_vm14, 1.0, %v1981_v0  ;;  %v1389_v30 = vld [vmem:[#allocation6 + $0x160] sm:$0xff]  ;;  %1669 = vmatprep.subr.mxu1 %v1373_v27  ;;  %1710 = vmatprep.subr.mxu0 %v1405_v28  ;;  %v1378_v19 = vld [vmem:[#allocation6 + $0x108] sm:$0xff] }
 0x396   :  { %1882 = vperm.xlu1 %1880, %v1881_v13   ;;  %vm715_vm0 = vmand %vm577_vm12, %vm712_vm15  ;;  %v1404_v13 = vld [vmem:[#allocation6 + $0x1d8] sm:$0xff]  ;;  %1670 = vmatpush3.msra.mxu1 %v1357_v29  ;;  %v1361_v59 = vld [vmem:[#allocation6 + $0x80] sm:$0xff]  ;;  %v987_v29 = vpop.f32.mrf.mxu1 }
 0x397   :  { %v718_v32 = vsel %vm715_vm0, 1.0, %v1981_v0  ;;  %1711 = vmatpush3.msra.mxu0 %v1389_v30  ;;  %1671 = vmatprep.subr.mxu1 %v1372_v11  ;;  %v1393_v20 = vld [vmem:[#allocation6 + $0x180] sm:$0xff]  ;;  %v1070_v30 = vpop.f32.mrf.mxu0 }
 0x398   :  { %v1886_v33 = vpack.i.bf16 %v718_v32, %v709_v31  ;;  %v1356_v31 = vld [vmem:[#allocation6 + $0x58] sm:$0xff]  ;;  %1712 = vmatprep.subr.mxu0 %v1404_v13  ;;  %v1345_v24 = vld [vmem:[#allocation6] sm:$0xff]  ;;  %v989_v11 = vpop.f32.mrf.mxu1 }
 0x399   :  { %v1388_v32 = vld [vmem:[#allocation6 + $0x158] sm:$0xff]  ;;  %1672 = vmatpush3.msra.mxu1 %v1356_v31  ;;  %v1377_v25 = vld [vmem:[#allocation6 + $0x100] sm:$0xff]  ;;  %v1072_v13 = vpop.f32.mrf.mxu0 }
 0x39a   :  { %1887 = vperm.xlu1 %1880, %v1886_v33   ;;  %v1371_v33 = vld [vmem:[#allocation6 + $0xd0] sm:$0xff]  ;;  %1713 = vmatpush3.msra.mxu0 %v1388_v32  ;;  %v993_v31 = vpop.f32.mrf.mxu1 }
 0x39b   :  { %1673 = vmatprep.subr.mxu1 %v1371_v33  ;;  %v1076_v32 = vpop.f32.mrf.mxu0 }
 0x39c   :  { %1674 = vmatpush3.msra.mxu1 %v1355_v22 }
 0x39d   :  { %v1078_v33 = vpop.f32.mrf.mxu0 }
 0x39e   :  { %1892 = vset.pattern.permute.xlu1 %v1986_v10 }
 0x39f   :  { %v2418_v22 = vpop.f32.mrf.mxu0 }
 0x409   :  { %v1877_v34 = vpop.permute.xlu0 %1876 }
 0x40a   :  { %v1879_v23 = vunpack.i.h.bf16 %v1877_v34  ;;  %v1878_v35 = vunpack.i.l.bf16 %v1877_v34  ;;  %v1403_v34 = vld [vmem:[#allocation6 + $0x1d0] sm:$0xff] }
 0x40b   :  { %1714 = vmatprep.subr.mxu0 %v1403_v34 }
 0x40c   :  { %v750_v36 = vsel %vm719_vm1, %v1878_v35, %v1879_v23  ;;  %v1387_v23 = vld [vmem:[#allocation6 + $0x150] sm:$0xff]  ;;  %v1370_v35 = vld [vmem:[#allocation6 + $0xc8] sm:$0xff] }
 0x40d   :  { %v753_v38 = vmul.f32 0.0, %v750_v36  ;;  %v1402_v36 = vld [vmem:[#allocation6 + $0x1c8] sm:$0xff]  ;;  %1715 = vmatpush3.msra.mxu0 %v1387_v23  ;;  %1675 = vmatprep.subr.mxu1 %v1370_v35  ;;  %v2421_v35 = vpop.f32.mrf.mxu0 }
 0x40e   :  { %1716 = vmatprep.subr.mxu0 %v1402_v36 }
 0x40f   :  { %v756_v39 = vadd.f32 %v753_v38, %v572_v37  ;;  %v1354_v37 = vld [vmem:[#allocation6 + $0x48] sm:$0xff]  ;;  %v1236_v36 = vpop.f32.mrf.mxu0 }
 0x410   :  { %v1386_v38 = vld [vmem:[#allocation6 + $0x148] sm:$0xff]  ;;  %1676 = vmatpush3.msra.mxu1 %v1354_v37 }
 0x411   :  { %v1883_v0 = vpop.permute.xlu1 %1882  ;;  %v760_v40 = vsel %vm759_vm2, %v756_v39, -inf  ;;  %1717 = vmatpush3.msra.mxu0 %v1386_v38  ;;  %v1253_v38 = vld [vmem:[%s2454_s11] sm:$0xf] }
 0x412   :  { %v1885_v41 = vunpack.i.h.bf16 %v1883_v0  ;;  %v1884_v42 = vunpack.i.l.bf16 %v1883_v0  ;;  %761 = vmax.xlane.f32.xlu1 %v760_v40  ;;  %v1401_v0 = vld [vmem:[#allocation6 + $0x1c0] sm:$0xff] }
 0x413   :  { %v1353_v40 = vld [vmem:[#allocation6 + $0x40] sm:$0xff]  ;;  %1718 = vmatprep.subr.mxu0 %v1401_v0 }
 0x414   :  { %v751_v43 = vsel %vm719_vm1, %v1884_v42, %v1885_v41  ;;  %v1385_v41 = vld [vmem:[#allocation6 + $0x140] sm:$0xff]  ;;  %v1368_v42 = vld [vmem:[#allocation6 + $0xb8] sm:$0xff] }
 0x415   :  { %v1888_v46 = vpop.permute.xlu1 %1887  ;;  %v754_v47 = vmul.f32 0.0, %v751_v43  ;;  %v1400_v43 = vld [vmem:[#allocation6 + $0x1b8] sm:$0xff]  ;;  %1719 = vmatpush3.msra.mxu0 %v1385_v41  ;;  %v1238_v41 = vpop.f32.mrf.mxu0 }
 0x416   :  { %v1890_v45 = vunpack.i.h.bf16 %v1888_v46  ;;  %v1889_v48 = vunpack.i.l.bf16 %v1888_v46  ;;  %v1384_v46 = vld [vmem:[#allocation6 + $0x138] sm:$0xff]  ;;  %1720 = vmatprep.subr.mxu0 %v1400_v43 }
 0x417   :  { %v757_v49 = vadd.f32 %v754_v47, %v573_v44  ;;  %v1352_v44 = vld [vmem:[#allocation6 + $0x38] sm:$0xff]  ;;  %v1367_v47 = vld [vmem:[#allocation6 + $0xb0] sm:$0xff]  ;;  %1721 = vmatpush3.msra.mxu0 %v1384_v46  ;;  %v1237_v46 = vadd.f32 %v1236_v36, %v1070_v30  ;;  %v1610_v36 = vld [vmem:[%s2456_s13] ss:$0 sm:$0xff] }
 0x418   :  { %v752_v6 = vsel %vm719_vm1, %v1889_v48, %v1890_v45  ;;  %v1399_v45 = vld [vmem:[#allocation6 + $0x1b0] sm:$0xff] }
 0x419   :  { %v763_v51 = vsel %vm759_vm2, %v757_v49, -inf  ;;  %v755_v52 = vmul.f32 0.0, %v752_v6  ;;  %v1351_v48 = vld [vmem:[#allocation6 + $0x30] sm:$0xff]  ;;  %v1366_v6 = vld [vmem:[#allocation6 + $0xa8] sm:$0xff]  ;;  %1722 = vmatprep.subr.mxu0 %v1399_v45 }
 0x41a   :  { %764 = vmax.xlane.f32.xlu0 %v763_v51  ;;  %v1350_v51 = vld [vmem:[#allocation6 + $0x28] sm:$0xff] }
 0x41b   :  { %v758_v53 = vadd.f32 %v755_v52, %v574_v50  ;;  %v1398_v50 = vld [vmem:[#allocation6 + $0x1a8] sm:$0xff] }
 0x41c   :  { %v1382_v52 = vld [vmem:[#allocation6 + $0x128] sm:$0xff] }
 0x41d   :  { %v766_v54 = vsel %vm759_vm2, %v758_v53, -inf }
 0x41e   :  { %767 = vmax.xlane.f32.xlu1 %v766_v54  ;;  %v1397_v54 = vld [vmem:[#allocation6 + $0x1a0] sm:$0xff] }
 0x49b   :  { %v762_v55 = vpop.xlane.xlu1 %761 }
 0x49c   :  { %v769_v16 = vsub.f32 %v756_v39, %v762_v55  ;;  %v1369_v39 = vld [vmem:[#allocation6 + $0xc0] sm:$0xff] }
 0x49d   :  { %1677 = vmatprep.subr.mxu1 %v1369_v39  ;;  %v1349_v55 = vld [vmem:[#allocation6 + $0x20] sm:$0xff] }
 0x49e   :  { %v772_v56 = vmul.f32 1.442695, %v769_v16  ;;  %1678 = vmatpush3.msra.mxu1 %v1353_v40  ;;  %v1381_v16 = vld [vmem:[#allocation6 + $0x120] sm:$0xff] }
 0x49f   :  { %1679 = vmatprep.subr.mxu1 %v1368_v42 }
 0x4a0   :  { %1898 = vpow2.f32 %v772_v56  ;;  %1680 = vmatpush3.msra.mxu1 %v1352_v44  ;;  %v1364_v56 = vld [vmem:[#allocation6 + $0x98] sm:$0xff] }
 0x4a1   :  { %1681 = vmatprep.subr.mxu1 %v1367_v47 }
 0x4a2   :  { %1682 = vmatpush3.msra.mxu1 %v1351_v48  ;;  %v1239_v48 = vadd.f32 %v1238_v41, %v1072_v13 }
 0x4a3   :  { %v765_v57 = vpop.xlane.xlu0 %764  ;;  %1683 = vmatprep.subr.mxu1 %v1366_v6 }
 0x4a4   :  { %v770_v58 = vsub.f32 %v757_v49, %v765_v57  ;;  %v1383_v49 = vld [vmem:[#allocation6 + $0x130] sm:$0xff]  ;;  %1684 = vmatpush3.msra.mxu1 %v1350_v51  ;;  %v1396_v57 = vld [vmem:[#allocation6 + $0x198] sm:$0xff] }
 0x4a5   :  { %1723 = vmatpush3.msra.mxu0 %v1383_v49 }
 0x4a6   :  { %v774_v61 = vmul.f32 1.442695, %v770_v58  ;;  %1724 = vmatprep.subr.mxu0 %v1398_v50  ;;  %v1348_v58 = vld [vmem:[#allocation6 + $0x18] sm:$0xff] }
 0x4a7   :  { %v768_v62 = vpop.xlane.xlu1 %767  ;;  %1725 = vmatpush3.msra.mxu0 %v1382_v52 }
 0x4a8   :  { %1900 = vpow2.f32 %v774_v61  ;;  %v771_v9 = vsub.f32 %v758_v53, %v768_v62  ;;  %v1365_v53 = vld [vmem:[#allocation6 + $0xa0] sm:$0xff]  ;;  %1726 = vmatprep.subr.mxu0 %v1397_v54  ;;  %v1380_v61 = vld [vmem:[#allocation6 + $0x118] sm:$0xff]  ;;  %v1363_v62 = vld [vmem:[#allocation6 + $0x90] sm:$0xff] }
 0x4a9   :  { %1685 = vmatprep.subr.mxu1 %v1365_v53  ;;  %1727 = vmatpush3.msra.mxu0 %v1381_v16  ;;  %v1242_v16 = vpop.f32.mrf.mxu0 }
 0x4aa   :  { %v776_v63 = vmul.f32 1.442695, %v771_v9  ;;  %1686 = vmatpush3.msra.mxu1 %v1349_v55  ;;  %v1395_v9 = vld [vmem:[#allocation6 + $0x190] sm:$0xff]  ;;  %1728 = vmatprep.subr.mxu0 %v1396_v57 }
 0x4ab   :  { %1687 = vmatprep.subr.mxu1 %v1364_v56  ;;  %1729 = vmatpush3.msra.mxu0 %v1380_v61 }
 0x4ac   :  { %1902 = vpow2.f32 %v776_v63  ;;  %v1347_v63 = vld [vmem:[#allocation6 + $0x10] sm:$0xff]  ;;  %1688 = vmatpush3.msra.mxu1 %v1348_v58  ;;  %1730 = vmatprep.subr.mxu0 %v1395_v9 }
 0x4ad   :  { %v2397_v21 = vpop.eup %1898  ;;  %1689 = vmatprep.subr.mxu1 %v1363_v62 }
 0x4ae   :  { %v778_v2 = vsel %vm759_vm2, %v2397_v21, 0.0  ;;  %1690 = vmatpush3.msra.mxu1 %v1347_v63  ;;  %v1244_v63 = vpop.f32.mrf.mxu0 }
 0x4af   :  { %779 = vadd.xlane.f32.xlu1 %v778_v2  ;;  %v1379_v2 = vld [vmem:[#allocation6 + $0x110] sm:$0xff] }
 0x4b0   :  { %1731 = vmatpush3.msra.mxu0 %v1379_v2 }
 0x4b5   :  { %v2401_v3 = vpop.eup %1900 }
 0x4b6   :  { %v781_v4 = vsel %vm759_vm2, %v2401_v3, 0.0 }
 0x4b7   :  { %782 = vadd.xlane.f32.xlu1 %v781_v4  ;;  %v1362_v4 = vld [vmem:[#allocation6 + $0x88] sm:$0xff] }
 0x4b8   :  { %1691 = vmatprep.subr.mxu1 %v1362_v4 }
 0x4b9   :  { %v2405_v5 = vpop.eup %1902  ;;  %1692 = vmatpush3.msra.mxu1 %v1346_v18 }
 0x4ba   :  { %v784_v7 = vsel %vm759_vm2, %v2405_v5, 0.0  ;;  %1693 = vmatprep.subr.mxu1 %v1361_v59  ;;  %v1248_v59 = vpop.f32.mrf.mxu0 }
 0x4bb   :  { %785 = vadd.xlane.f32.xlu1 %v784_v7  ;;  %v1394_v7 = vld [vmem:[#allocation6 + $0x188] sm:$0xff]  ;;  %1694 = vmatpush3.msra.mxu1 %v1345_v24 }
 0x4bc   :  { %1732 = vmatprep.subr.mxu0 %v1394_v7 }
 0x4bd   :  { %1733 = vmatpush3.msra.mxu0 %v1378_v19 }
 0x4be   :  { %1734 = vmatprep.subr.mxu0 %v1393_v20 }
 0x4bf   :  { %1735 = vmatpush3.msra.mxu0 %v1377_v25 }
 0x538   :  { %v780_v12 = vpop.xlane.xlu1 %779 }
 0x539   :  { %1904 = vrcp.f32 %v780_v12  ;;  %v1243_v12 = vadd.f32 %v1242_v16, %v1076_v32 }
 0x540   :  { %v783_v14 = vpop.xlane.xlu1 %782 }
 0x541   :  { %1906 = vrcp.f32 %v783_v14  ;;  %v1245_v14 = vadd.f32 %v1244_v63, %v1078_v33 }
 0x544   :  { %v786_v17 = vpop.xlane.xlu1 %785 }
 0x545   :  { %1908 = vrcp.f32 %v786_v17 }
 0x546   :  { %v1905_v15 = vpop.eup %1904 }
 0x547   :  { %v790_v60 = vmul.f32 %v1905_v15, %v2397_v21 }
 0x549   :  { %1310 = vperm.xlu1 %1892, %v790_v60   ;;  %1296 = vperm.xlu0 %1891, %v790_v60  }
 0x54d   :  { %1893 = vset.pattern.permute.xlu1 %v1983_v1  ;;  %1897 = vset.pattern.permute.xlu0 %v1986_v10 }
 0x54e   :  { %v1907_v26 = vpop.eup %1906 }
 0x54f   :  { %v791_v27 = vmul.f32 %v1907_v26, %v2401_v3  ;;  %v995_v3 = vpop.f32.mrf.mxu1 }
 0x551   :  { %1301 = vperm.xlu1 %1893, %v791_v27   ;;  %v999_v34 = vpop.f32.mrf.mxu1 }
 0x552   :  { %v1909_v21 = vpop.eup %1908 }
 0x553   :  { %v792_v28 = vmul.f32 %v1909_v21, %v2405_v5  ;;  %v1001_v23 = vpop.f32.mrf.mxu1  ;;  %v1256_v5 = vshrl.u32 %v176_v8, 7 }
 0x555   :  { %1894 = vset.pattern.permute.xlu1 %v1986_v10  ;;  %v1265_v37 = vsub.s32 2, %v1256_v5  ;;  %v1261_v0 = vsub.s32 1, %v1256_v5  ;;  %v1269_v40 = vsub.s32 3, %v1256_v5 }
 0x556   :  { %1314 = vperm.xlu1 %1894, %v791_v27  }
 0x557   :  { %v1266_v43 = vrot.slane %v1253_v38, %v1265_v37  ;;  %v1262_v8 = vrot.slane %v1253_v38, %v1261_v0  ;;  %v1270_v49 = vrot.slane %v1253_v38, %v1269_v40  ;;  %v1611_v0 = vld [vmem:[%s2456_s13 + $0x1] ss:$0 sm:$0xff] }
 0x559   :  { %v1277_v50 = vadd.f32 %v1266_v43, %v1237_v46  ;;  %v1278_v53 = vadd.f32 %v1270_v49, %v1239_v48  ;;  %v1281_v60 = vadd.f32 %v1266_v43, %v1243_v12  ;;  %v1282_v20 = vadd.f32 %v1270_v49, %v1245_v14 }
 0x55a   :  { %1895 = vset.pattern.permute.xlu1 %v1983_v1  ;;  %v1153_v1 = vpop.f32.mrf.mxu1 }
 0x55b   :  { %1306 = vperm.xlu1 %1895, %v792_v28   ;;  %v1154_v44 = vadd.f32 %v1153_v1, %v987_v29 }
 0x55c   :  { %v1155_v39 = vpop.f32.mrf.mxu1 }
 0x55d   :  { %v1156_v47 = vadd.f32 %v1155_v39, %v989_v11  ;;  %v1249_v11 = vadd.f32 %v1248_v59, %v2418_v22 }
 0x55e   :  { %v1159_v45 = vpop.f32.mrf.mxu1 }
 0x55f   :  { %1896 = vset.pattern.permute.xlu1 %v1986_v10  ;;  %v1257_v10 = vsub.s32 0, %v1256_v5  ;;  %v1276_v51 = vadd.f32 %v1262_v8, %v1156_v47  ;;  %v1160_v62 = vadd.f32 %v1159_v45, %v993_v31  ;;  %v1285_v33 = vadd.f32 %v1266_v43, %v1249_v11 }
 0x560   :  { %1318 = vperm.xlu1 %1896, %v792_v28   ;;  %v1161_v52 = vpop.f32.mrf.mxu1  ;;  %v1250_v28 = vpop.f32.mrf.mxu0 }
 0x561   :  { %v1258_v42 = vrot.slane %v1253_v38, %v1257_v10  ;;  %v1162_v9 = vadd.f32 %v1161_v52, %v995_v3  ;;  %v1251_v13 = vadd.f32 %v1250_v28, %v2421_v35 }
 0x562   :  { %v1165_v2 = vpop.f32.mrf.mxu1 }
 0x563   :  { %v1275_v6 = vadd.f32 %v1258_v42, %v1154_v44  ;;  %v1279_v4 = vadd.f32 %v1258_v42, %v1160_v62  ;;  %v1280_v7 = vadd.f32 %v1262_v8, %v1162_v9  ;;  %v1166_v24 = vadd.f32 %v1165_v2, %v999_v34 }
 0x564   :  { %v1167_v19 = vpop.f32.mrf.mxu1  ;;  %v1286_v5 = vadd.f32 %v1270_v49, %v1251_v13 }
 0x565   :  { %v1168_v25 = vadd.f32 %v1167_v19, %v1001_v23  ;;  %v1283_v29 = vadd.f32 %v1258_v42, %v1166_v24 }
 0x567   :  { %v1284_v30 = vadd.f32 %v1262_v8, %v1168_v25 }
 0x5c4   :  { %v1297_v54 = vpop.permute.xlu0 %1296  ;;  %v1311_v55 = vpop.permute.xlu1 %1310 }
 0x5c5   :  { %v1333_v56 = vmul.f32 %v1297_v54, %v1275_v6  ;;  %v1334_v57 = vmul.f32 %v1297_v54, %v1276_v51  ;;  %v1335_v58 = vmul.f32 %v1311_v55, %v1277_v50  ;;  %v1336_v61 = vmul.f32 %v1311_v55, %v1278_v53 }
 0x5c6   :  { %v1414_v35 = vmul.f32 %v1610_v36, %v1297_v54  ;;  %v1582_v42 = vmul.f32 %v1611_v0, %v1311_v55 }
 0x5c7   :  { %1481 = vmatprep.mubr.f32.mxu1 %v1334_v57  ;;  %1561 = vmatprep.mubr.f32.mxu0 %v1336_v61 }
 0x5c8   :  { %1482 = vmatmul.mubr.f32.vlgmr.msra.gmra.mxu1 %v1333_v56  ;;  %1562 = vmatmul.mubr.f32.vlgmr.msra.gmra.mxu0 %v1335_v58 }
 0x5cc   :  { %v1302_v15 = vpop.permute.xlu1 %1301 }
 0x5cd   :  { %v1337_v17 = vmul.f32 %v1302_v15, %v1279_v4  ;;  %v1338_v18 = vmul.f32 %v1302_v15, %v1280_v7  ;;  %v1415_v48 = vmul.f32 %v1610_v36, %v1302_v15 }
 0x5cf   :  { %1486 = vmatprep.mubr.f32.mxu1 %v1338_v18 }
 0x5d0   :  { %1487 = vmatmul.mubr.f32.gmra.mxu1 %v1337_v17 }
 0x5d1   :  { %v1315_v26 = vpop.permute.xlu1 %1314 }
 0x5d2   :  { %v1339_v27 = vmul.f32 %v1315_v26, %v1281_v60  ;;  %v1340_v21 = vmul.f32 %v1315_v26, %v1282_v20  ;;  %v1583_v51 = vmul.f32 %v1611_v0, %v1315_v26 }
 0x5d4   :  { %1566 = vmatprep.mubr.f32.mxu0 %v1340_v21 }
 0x5d5   :  { %1567 = vmatmul.mubr.f32.gmra.mxu0 %v1339_v27 }
 0x5d6   :  { %v1307_v31 = vpop.permute.xlu1 %1306 }
 0x5d7   :  { %v1341_v32 = vmul.f32 %v1307_v31, %v1283_v29  ;;  %v1342_v3 = vmul.f32 %v1307_v31, %v1284_v30  ;;  %v1416_v57 = vmul.f32 %v1610_v36, %v1307_v31 }
 0x5d9   :  { %1491 = vmatprep.mubr.f32.mxu1 %v1342_v3 }
 0x5da   :  { %1492 = vmatmul.mubr.f32.gmra.mxu1 %v1341_v32 }
 0x5db   :  { %v1319_v34 = vpop.permute.xlu1 %1318 }
 0x5dc   :  { %v1343_v23 = vmul.f32 %v1319_v34, %v1285_v33  ;;  %v1344_v1 = vmul.f32 %v1319_v34, %v1286_v5  ;;  %v1584_v9 = vmul.f32 %v1611_v0, %v1319_v34 }
 0x5de   :  { %1571 = vmatprep.mubr.f32.mxu0 %v1344_v1 }
 0x5df   :  { %1572 = vmatmul.mubr.f32.gmra.mxu0 %v1343_v23 }
 0x688   :  { %v1695_v10 = vpop.f32.mrf.mxu1  ;;  %v1736_v22 = vpop.f32.mrf.mxu0 }
 0x68a   :  { %v1696_v37 = vpop.f32.mrf.mxu1  ;;  %v1737_v39 = vpop.f32.mrf.mxu0 }
 0x68b   :  { %v1697_v38 = vadd.f32 %v1696_v37, %v1695_v10  ;;  %v1738_v41 = vadd.f32 %v1737_v39, %v1736_v22 }
 0x68d   :  { %v1484_v40 = vadd.f32 %v1697_v38, %v1414_v35 }
 0x68f   :  { %v1564_v43 = vadd.f32 %v1738_v41, %v1484_v40 }
 0x690   :  { %v1698_v44 = vpop.f32.mrf.mxu1 }
 0x691   :  { %v1585_v46 = vadd.f32 %v1582_v42, %v1564_v43 }
 0x692   :  { %v1699_v47 = vpop.f32.mrf.mxu1 }
 0x693   :  { %1588 = vst [vmem:[%s2458_s15] sm:$0xff] %v1585_v46  ;;  %v1700_v8 = vadd.f32 %v1699_v47, %v1698_v44 }
 0x695   :  { %v1739_v45 = vpop.f32.mrf.mxu0  ;;  %v1489_v6 = vadd.f32 %v1700_v8, %v1415_v48 }
 0x697   :  { %v1740_v49 = vpop.f32.mrf.mxu0 }
 0x698   :  { %v1741_v50 = vadd.f32 %v1740_v49, %v1739_v45 }
 0x69a   :  { %v1569_v52 = vadd.f32 %v1741_v50, %v1489_v6  ;;  %v1701_v53 = vpop.f32.mrf.mxu1 }
 0x69c   :  { %v1586_v54 = vadd.f32 %v1583_v51, %v1569_v52  ;;  %v1702_v16 = vpop.f32.mrf.mxu1 }
 0x69d   :  { %v1703_v55 = vadd.f32 %v1702_v16, %v1701_v53 }
 0x69e   :  { %1589 = vst [vmem:[%s2458_s15 + $0x8] sm:$0xff] %v1586_v54 }
 0x69f   :  { %v1742_v56 = vpop.f32.mrf.mxu0  ;;  %v1494_v61 = vadd.f32 %v1703_v55, %v1416_v57 }
 0x6a1   :  { %v1743_v58 = vpop.f32.mrf.mxu0 }
 0x6a2   :  { %v1744_v62 = vadd.f32 %v1743_v58, %v1742_v56 }
 0x6a4   :  { %v1574_v63 = vadd.f32 %v1744_v62, %v1494_v61 }
 0x6a6   :  { %v1587_v2 = vadd.f32 %v1584_v9, %v1574_v63 }
 0x6a8   :  { %1590 = vst [vmem:[%s2458_s15 + $0x10] sm:$0xff] %v1587_v2 }
 0x6a9   :  { %1599 = vsyncpa [#allocation3], 1 }
 0x6aa   :  { %1600 = vsyncpa [#allocation5], 1 }

</bundles_post_ra>
